<compile_context>
chip_gen: v5e
topology: v5e:2x2
jax: 0.10.0
libtpu: 0.0.40
codegen_flags: <defaults>
</compile_context>

<pallas_src>
import functools

import jax
import jax.numpy as jnp
from jax.experimental import pallas as pl
from jax.experimental.pallas import tpu as pltpu


def _dirac_conv_kernel(x_ref, w_ref, b_ref, o_ref, *,
                       stride_h, stride_w, kh_sz, kw_sz):
    """Fused ReLU + conv2d + bias for one (batch element, output-row block).

    x_ref: (1, Hp, Wp, Cin_p)        zero-padded bf16 input (one image)
    w_ref: (Kh*Kw*Cin_p, Cout_p)     bf16 weights, tap-major / channel-minor
    b_ref: (1, Cout_p)               f32 bias
    o_ref: (1, BH, Wo, Cout_p)       output row block
    """
    _, bh, wo, cout_p = o_ref.shape
    cin_p = x_ref.shape[-1]
    k_total = kh_sz * kw_sz * cin_p

    # Input row window (with Kh-1 halo) needed for this output-row block.
    win_h = (bh - 1) * stride_h + kh_sz
    row0 = pl.multiple_of(pl.program_id(1) * bh * stride_h, bh * stride_h)
    xwin = x_ref[0, pl.ds(row0, win_h), :, :]              # (win_h, Wp, Cin_p)
    xwin = jnp.maximum(xwin, jnp.zeros((), xwin.dtype))    # fused pre-act ReLU

    # im2col: gather the Kh*Kw shifted windows once.  Cin_p is a multiple of
    # 128, so the channel-axis concat is lane-aligned (no lane shifting).
    # TODO(synk): stride > 1 uses a strided value slice; DiracNetV2 is
    # stride-1 everywhere and the strided path is untested on hardware.
    taps = []
    for kh in range(kh_sz):
        for kw in range(kw_sz):
            taps.append(xwin[kh:kh + (bh - 1) * stride_h + 1:stride_h,
                             kw:kw + (wo - 1) * stride_w + 1:stride_w, :])
    patch = taps[0] if len(taps) == 1 else jnp.concatenate(taps, axis=-1)
    patch = patch.reshape(bh * wo, k_total)                # (M, K)

    # One MXU matmul per row block, K = Kh*Kw*Cin_p, f32 accumulation.
    acc = jnp.dot(patch, w_ref[...], preferred_element_type=jnp.float32)
    acc = acc + b_ref[...]                                 # (M, C) + (1, C)
    o_ref[...] = acc.reshape(1, bh, wo, cout_p).astype(o_ref.dtype)


def _pair(v):
    return (v, v) if isinstance(v, int) else tuple(v)


def _round_up(n, m):
    return ((n + m - 1) // m) * m


def _vmem_capacity_bytes():
    try:
        info = pltpu.get_tpu_info()
        for name in ("vmem_capacity_bytes", "vmem_bytes", "vmem_size_bytes"):
            v = getattr(info, name, None)
            if v:
                return int(v)
    except Exception:
        pass
    return 64 * 1024 * 1024            # conservative fallback (v7x per-TC VMEM)


def _footprint_bytes(bh, *, ho, wo, sh, kh, hp, wp, cin_p, cout_p, k_total,
                     out_itemsize):
    """Rough per-grid-step VMEM footprint (double-buffered blocks + scratch)."""
    n_hblk = pl.cdiv(ho, bh)
    hp_pad = max(hp, (n_hblk * bh - 1) * sh + kh)
    m = bh * wo
    win_h = (bh - 1) * sh + kh
    x_blk = hp_pad * wp * cin_p * 2                  # resident bf16 image
    o_blk = m * cout_p * out_itemsize                # output row block
    fixed = k_total * cout_p * 2 + cout_p * 4        # weights + bias
    scratch = (2 * m * k_total * 2                   # taps + im2col patch (bf16)
               + m * cout_p * 4                      # f32 accumulator
               + 2 * win_h * wp * cin_p * 2)         # row window + ReLU copy
    return 2 * (x_blk + o_blk + fixed) + scratch


def _pick_block_h(ho, wo, cout_p, k_total, budget_bytes=2 << 20):
    # Review item #2: keep (f32 accumulator + bf16 im2col patch) around
    # 1-2 MiB so MXU result tiles stay near the vreg file instead of streaming
    # through VMEM loads/stores.
    per_row = wo * (cout_p * 4 + k_total * 2)
    return int(max(1, min(ho, budget_bytes // max(per_row, 1))))


def dirac_conv_nhwc(x_nhwc, weight_oihw, bias, *, stride, padding,
                    block_h=None, out_dtype=jnp.float32):
    """DiracConv forward on NHWC input: conv2d(relu(x)) + bias (weight OIHW)."""
    sh, sw = _pair(stride)
    ph, pw = _pair(padding)

    n, h, w, cin = x_nhwc.shape
    cout, cin_w, kh, kw = weight_oihw.shape
    assert cin == cin_w, (cin, cin_w)

    ho = (h + 2 * ph - kh) // sh + 1
    wo = (w + 2 * pw - kw) // sw + 1

    # Lane-dense output channels (unmasked vst) and lane-aligned input
    # channels (aligned in-kernel im2col concat).  Padded channels are zero in
    # both activations and weights, so results are unchanged.
    cout_p = _round_up(cout, 128)
    cin_p = _round_up(cin, 128)
    k_total = kh * kw * cin_p

    hp, wp = h + 2 * ph, w + 2 * pw
    out_itemsize = jnp.dtype(out_dtype).itemsize
    vmem_cap = _vmem_capacity_bytes()

    if block_h is None:
        block_h = _pick_block_h(ho, wo, cout_p, k_total)
    block_h = int(max(1, min(block_h, ho)))
    fp_kw = dict(ho=ho, wo=wo, sh=sh, kh=kh, hp=hp, wp=wp, cin_p=cin_p,
                 cout_p=cout_p, k_total=k_total, out_itemsize=out_itemsize)
    # Shrink to fit the actual device VMEM (review item #4: per-generation).
    while block_h > 1 and _footprint_bytes(block_h, **fp_kw) > vmem_cap - (8 << 20):
        block_h = max(1, block_h // 2)

    n_hblk = int(pl.cdiv(ho, block_h))
    ho_pad = n_hblk * block_h                        # ragged Ho -> padded rows
    hp_need = (ho_pad - 1) * sh + kh
    pad_bottom = ph + max(0, hp_need - hp)
    hp_pad = h + ph + pad_bottom

    # NHWC, bf16, spatial zero pad (ReLU(0)==0, so zero-padding before the
    # fused ReLU is equivalent to conv padding after ReLU), channel zero pad.
    x_pad = jnp.pad(x_nhwc.astype(jnp.bfloat16),
                    ((0, 0), (ph, pad_bottom), (pw, pw), (0, cin_p - cin)))

    # OIHW -> (Kh, Kw, Cin, Cout) -> pad channels -> (Kh*Kw*Cin_p, Cout_p).
    w_k = jnp.transpose(weight_oihw, (2, 3, 1, 0))
    w_k = jnp.pad(w_k, ((0, 0), (0, 0), (0, cin_p - cin), (0, cout_p - cout)))
    w2d = w_k.reshape(k_total, cout_p).astype(jnp.bfloat16)
    b2d = jnp.pad(bias, (0, cout_p - cout)).reshape(1, cout_p).astype(jnp.float32)

    vmem_limit = int(min(vmem_cap,
                         max(32 << 20,
                             _footprint_bytes(block_h, **fp_kw) + (16 << 20))))

    kernel = functools.partial(_dirac_conv_kernel, stride_h=sh, stride_w=sw,
                               kh_sz=kh, kw_sz=kw)

    out = pl.pallas_call(
        kernel,
        out_shape=jax.ShapeDtypeStruct((n, ho_pad, wo, cout_p), out_dtype),
        grid=(n, n_hblk),
        in_specs=[
            # Padded image of the current batch element; block index constant
            # along the row-block axis => DMA'd once per image (revisited).
            pl.BlockSpec((1, hp_pad, wp, cin_p), lambda b, i: (b, 0, 0, 0)),
            # Grid-invariant weights / bias stay resident for the whole grid.
            # TODO(synk): pipeline_mode=pl.Buffered(1) would drop their second
            # buffer; left at the default to keep lowering conservative.
            pl.BlockSpec((k_total, cout_p), lambda b, i: (0, 0)),
            pl.BlockSpec((1, cout_p), lambda b, i: (0, 0)),
        ],
        out_specs=pl.BlockSpec((1, block_h, wo, cout_p),
                               lambda b, i: (b, i, 0, 0)),
        compiler_params=pltpu.CompilerParams(
            # Disjoint output blocks on both axes -> both parallel, so v7x can
            # shard row blocks across its two TensorCores even at batch 1.
            dimension_semantics=("parallel", "parallel"),
            vmem_limit_bytes=vmem_limit),
    )(x_pad, w2d, b2d)

    return out[:, :ho, :, :cout]                     # drop Ho / Cout padding


def dirac_conv(x_nchw, weight_oihw, bias, *, stride, padding,
               block_h=None, out_dtype=jnp.float32):
    """PyTorch-parity NCHW wrapper: conv2d(relu(x)) + bias.

    For a full DiracNet stack prefer dirac_conv_nhwc and convert layouts once
    at the network boundary -- the two transposes here are per-call HBM round
    trips that do not fuse away.
    """
    x_nhwc = jnp.transpose(x_nchw, (0, 2, 3, 1))
    out = dirac_conv_nhwc(x_nhwc, weight_oihw, bias, stride=stride,
                          padding=padding, block_h=block_h, out_dtype=out_dtype)
    return jnp.transpose(out, (0, 3, 1, 2))


if __name__ == "__main__":
    key = jax.random.PRNGKey(0)
    kx, kw_, kb = jax.random.split(key, 3)

    # DiracNetV2 DiracConv config: 3x3, stride 1, padding 1.
    in_channels, out_channels = 4, 8
    kernel_size, stride, padding = 3, 1, 1

    x = jax.random.normal(kx, (2, in_channels, 16, 16), dtype=jnp.float32)
    weight = 0.1 * jax.random.normal(
        kw_, (out_channels, in_channels, kernel_size, kernel_size),
        dtype=jnp.float32)
    bias = 0.1 * jax.random.normal(kb, (out_channels,), dtype=jnp.float32)

    # Reference with the same bf16 activations/weights and f32 accumulation
    # (the bf16 cast is a deliberate precision choice vs. a plain f32 conv).
    relu_bf16 = jnp.maximum(x.astype(jnp.bfloat16), 0.0)
    ref = jax.lax.conv_general_dilated(
        relu_bf16, weight.astype(jnp.bfloat16),
        window_strides=(stride, stride),
        padding=((padding, padding), (padding, padding)),
        dimension_numbers=("NCHW", "OIHW", "NCHW"),
        preferred_element_type=jnp.float32,
    ) + bias[None, :, None, None]

    # 1) Auto block_h (single row block per image at this size).
    out_auto = dirac_conv(x, weight, bias, stride=stride, padding=padding)
    # 2) block_h that does not divide Ho (16 -> blocks of 6, Ho padded to 18)
    #    to exercise the ragged-tail / padded-row path.
    out_ragged = dirac_conv(x, weight, bias, stride=stride, padding=padding,
                            block_h=6)
    out_auto, out_ragged = jax.block_until_ready((out_auto, out_ragged))

    assert out_auto.shape == ref.shape == (2, out_channels, 16, 16)
    assert out_ragged.shape == ref.shape
    err_a = float(jnp.max(jnp.abs(out_auto - ref)))
    err_r = float(jnp.max(jnp.abs(out_ragged - ref)))
    assert jnp.allclose(out_auto, ref, atol=2e-3, rtol=2e-3), err_a
    assert jnp.allclose(out_ragged, ref, atol=2e-3, rtol=2e-3), err_r

    print("KERNEL_OK")
</pallas_src>

<mosaic_0001>
module attributes {stable_mosaic.version = 11 : i64} {
  func.func @_dirac_conv_kernel(%arg0: i32, %arg1: i32, %arg2: memref<1x18x18x128xbf16, #tpu.memory_space<vmem>>, %arg3: memref<1152x128xbf16, #tpu.memory_space<vmem>>, %arg4: memref<1x128xf32, #tpu.memory_space<vmem>>, %arg5: memref<1x16x16x128xf32, #tpu.memory_space<vmem>>) attributes {dimension_semantics = [#tpu.dimension_semantics<parallel>, #tpu.dimension_semantics<parallel>], iteration_bounds = array<i64: 2, 1>, scalar_prefetch = 0 : i64, scratch_operands = 0 : i64, tpu.core_type = #tpu.core_type<tc>, window_params = [{transform_indices = @transform_0, window_bounds = array<i64: 1, 18, 18, 128>}, {pipeline_mode = #tpu.pipeline_mode<synchronous>, transform_indices = @transform_1, window_bounds = array<i64: 1152, 128>}, {pipeline_mode = #tpu.pipeline_mode<synchronous>, transform_indices = @transform_2, window_bounds = array<i64: 1, 128>}, {transform_indices = @transform_3, window_bounds = array<i64: 1, 16, 16, 128>}]} {
    %c16_i32 = arith.constant 16 : i32
    %0 = arith.muli %arg1, %c16_i32 : i32
    %c1_i32 = arith.constant 1 : i32
    %1 = arith.muli %0, %c1_i32 : i32
    %2 = tpu.assume_multiple %1, 16 : i32
    %c0 = arith.constant 0 : index
    %3 = arith.index_cast %2 : i32 to index
    %c0_0 = arith.constant 0 : index
    %c0_1 = arith.constant 0 : index
    %4 = vector.load %arg2[%c0, %3, %c0_0, %c0_1] : memref<1x18x18x128xbf16, #tpu.memory_space<vmem>>, vector<1x18x18x128xbf16>
    %5 = vector.shape_cast %4 : vector<1x18x18x128xbf16> to vector<18x18x128xbf16>
    %cst = arith.constant 0.000000e+00 : bf16
    %6 = vector.broadcast %cst : bf16 to vector<18x18x128xbf16>
    %7 = arith.maximumf %5, %6 : vector<18x18x128xbf16>
    %8 = vector.extract_strided_slice %7 {offsets = [0, 0, 0], sizes = [16, 16, 128], strides = [1, 1, 1]} : vector<18x18x128xbf16> to vector<16x16x128xbf16>
    %9 = vector.extract_strided_slice %7 {offsets = [0, 1, 0], sizes = [16, 16, 128], strides = [1, 1, 1]} : vector<18x18x128xbf16> to vector<16x16x128xbf16>
    %10 = vector.extract_strided_slice %7 {offsets = [0, 2, 0], sizes = [16, 16, 128], strides = [1, 1, 1]} : vector<18x18x128xbf16> to vector<16x16x128xbf16>
    %11 = vector.extract_strided_slice %7 {offsets = [1, 0, 0], sizes = [16, 16, 128], strides = [1, 1, 1]} : vector<18x18x128xbf16> to vector<16x16x128xbf16>
    %12 = vector.extract_strided_slice %7 {offsets = [1, 1, 0], sizes = [16, 16, 128], strides = [1, 1, 1]} : vector<18x18x128xbf16> to vector<16x16x128xbf16>
    %13 = vector.extract_strided_slice %7 {offsets = [1, 2, 0], sizes = [16, 16, 128], strides = [1, 1, 1]} : vector<18x18x128xbf16> to vector<16x16x128xbf16>
    %14 = vector.extract_strided_slice %7 {offsets = [2, 0, 0], sizes = [16, 16, 128], strides = [1, 1, 1]} : vector<18x18x128xbf16> to vector<16x16x128xbf16>
    %15 = vector.extract_strided_slice %7 {offsets = [2, 1, 0], sizes = [16, 16, 128], strides = [1, 1, 1]} : vector<18x18x128xbf16> to vector<16x16x128xbf16>
    %16 = vector.extract_strided_slice %7 {offsets = [2, 2, 0], sizes = [16, 16, 128], strides = [1, 1, 1]} : vector<18x18x128xbf16> to vector<16x16x128xbf16>
    %17 = tpu.concatenate %8, %9, %10, %11, %12, %13, %14, %15, %16 in 2 : vector<16x16x128xbf16>, vector<16x16x128xbf16>, vector<16x16x128xbf16>, vector<16x16x128xbf16>, vector<16x16x128xbf16>, vector<16x16x128xbf16>, vector<16x16x128xbf16>, vector<16x16x128xbf16>, vector<16x16x128xbf16> -> vector<16x16x1152xbf16>
    %18 = vector.shape_cast %17 : vector<16x16x1152xbf16> to vector<256x1152xbf16>
    %c0_2 = arith.constant 0 : index
    %c0_3 = arith.constant 0 : index
    %19 = vector.load %arg3[%c0_2, %c0_3] : memref<1152x128xbf16, #tpu.memory_space<vmem>>, vector<1152x128xbf16>
    %cst_4 = arith.constant dense<0.000000e+00> : vector<256x128xf32>
    %20 = tpu.matmul %18, %19, %cst_4 {dimension_numbers = #tpu.dot_dimension_numbers<[1], [0], [0], [1], [0, 0, 1, 1], [], []>} : vector<256x1152xbf16>, vector<1152x128xbf16>, vector<256x128xf32> -> vector<256x128xf32>
    %c0_5 = arith.constant 0 : index
    %c0_6 = arith.constant 0 : index
    %21 = vector.load %arg4[%c0_5, %c0_6] : memref<1x128xf32, #tpu.memory_space<vmem>>, vector<1x128xf32>
    %22 = vector.broadcast %21 : vector<1x128xf32> to vector<256x128xf32>
    %23 = arith.addf %20, %22 : vector<256x128xf32>
    %24 = vector.shape_cast %23 : vector<256x128xf32> to vector<1x16x16x128xf32>
    %c0_7 = arith.constant 0 : index
    %c0_8 = arith.constant 0 : index
    %c0_9 = arith.constant 0 : index
    %c0_10 = arith.constant 0 : index
    %25 = vector.load %arg5[%c0_7, %c0_8, %c0_9, %c0_10] : memref<1x16x16x128xf32, #tpu.memory_space<vmem>>, vector<1x16x16x128xf32>
    tpu.vector_store %arg5[%c0_7, %c0_8, %c0_9, %c0_10], %24 {strides = array<i32>} : memref<1x16x16x128xf32, #tpu.memory_space<vmem>>, vector<1x16x16x128xf32>,
    return
  }
  func.func @transform_0(%arg0: i32, %arg1: i32) -> (i32, i32, i32, i32) {
    %c0_i32 = arith.constant 0 : i32
    %c0_i32_0 = arith.constant 0 : i32
    %c0_i32_1 = arith.constant 0 : i32
    %c0_i32_2 = arith.constant 0 : i32
    return %arg0, %c0_i32, %c0_i32_0, %c0_i32_1 : i32, i32, i32, i32
  }
  func.func @transform_1(%arg0: i32, %arg1: i32) -> (i32, i32) {
    %c0_i32 = arith.constant 0 : i32
    %c0_i32_0 = arith.constant 0 : i32
    %c0_i32_1 = arith.constant 0 : i32
    return %c0_i32, %c0_i32_0 : i32, i32
  }
  func.func @transform_2(%arg0: i32, %arg1: i32) -> (i32, i32) {
    %c0_i32 = arith.constant 0 : i32
    %c0_i32_0 = arith.constant 0 : i32
    %c0_i32_1 = arith.constant 0 : i32
    return %c0_i32, %c0_i32_0 : i32, i32
  }
  func.func @transform_3(%arg0: i32, %arg1: i32) -> (i32, i32, i32, i32) {
    %c0_i32 = arith.constant 0 : i32
    %c0_i32_0 = arith.constant 0 : i32
    %c0_i32_1 = arith.constant 0 : i32
    return %arg0, %arg1, %c0_i32, %c0_i32_0 : i32, i32, i32, i32
  }
}

</mosaic_0001>

<bundles_post_ra>
// kernel: tpu_custom_call.1
= control target key start
LH: loop header
LB: loop body
LE: loop exit
PB: predicated region body
PF: predicated region fallthrough
CT: control target
= control target key end

     0   :  { %8 = vsyncpa [#allocation3], 0  ;;  %s3962_s0 = inlined_call_operand.vmem [shape: bf16[2,18,18,128], index: 0, kind: input, shape index: {}]   ;;  %s3963_s1 = inlined_call_operand.vmem [shape: bf16[1152,128], index: 1, kind: input, shape index: {}]   ;;  %s3964_s2 = inlined_call_operand.vmem [shape: f32[1,128], index: 2, kind: input, shape index: {}]   ;;  %s3965_s3 = inlined_call_operand.hbm [shape: f32[2,16,16,128], index: 3, kind: output, shape index: {}]  }
   0x1   :  { %10 = vsyncpa [#allocation3 + $0x1], 0  ;;  %s2983_s12 = smov 0   ;;  %s2985_s13 = smov 0  }
   0x2   :  { %s2987_s14 = smov 0   ;;  %s2989_s15 = smov 0  }
   0x3   :  { %s2991_s16 = smov 0   ;;  %s2993_s17 = smov 0  }
   0x4 LB: > { %s2381_s18 = sadd.s32 4294967295, %s2959_s17   ;;  %s2382_s19 = sadd.s32 4294967294, %s2959_s17   ;;  %s2959_s17 = sphi %s2993_s17, %s16_s17   ;;  %s2955_s16 = sphi %s2991_s16, %s4065_s16   ;;  %s2951_s15 = sphi %s2989_s15, %s4064_s15   ;;  %s2947_s14 = sphi %s2987_s14, %s4063_s14   ;;  %s2943_s13 = sphi %s2985_s13, %s4062_s13   ;;  %s2939_s12 = sphi %s2983_s12, %s4061_s12  }
   0x5   : > { %s28_s20 = sadd.s32 1, %s2955_s16  ;;  %s105_s21 = sadd.s32 1, %s2947_s14 }
   0x6   : > { %p30_p0 = scmp.ge.s32.totalorder %s28_s20, 2  ;;  %p115_p1 = scmp.ne.s32.totalorder %s2947_s14, %s2943_s13 }
   0x7   : > { %p116_p2 = scmp.eq.s32.totalorder %s2381_s18, 1  ;;  %p121_p3 = scmp.ne.s32.totalorder %s2943_s13, %s2939_s12 }
   0x8   : > { %s4067_s20 = smov (%p30_p0, %s28_s20), 0  ;;  %p122_p5 = scmp.eq.s32.totalorder %s2382_s19, 1 }
   0x9   : > { %p3023_p4 = por %p116_p2, %p115_p1  ;;  %s100_s23 = ssub.s32 %s2955_s16, %s4067_s20 }
   0xa   : > { %p2385_p6 = scmp.ge.s32.totalorder %s2959_s17, 1  ;;  %p103_p7 = scmp.eq.s32.totalorder %s100_s23, 0 }
   0xb   : > { %p3030_p8 = por %p122_p5, %p121_p3  ;;  %p154_p9 = scmp.lt.s32.totalorder %s2959_s17, 3 }
   0xc   : > { %s3036_s25 = scalar_select %p103_p7, %s2947_s14, %s105_s21  }
   0xd   : > { %p155_p10 = pnand %p2385_p6, %p154_p9 }
   0xf   : > { %158 = sbr.rel (%p155_p10) target bundleno = 762 (0x2fa), region = 32 }
  0x14   : > { %v2688_v0 = vld [vmem:[%s3963_s1 + $0x38] sm:$0xff]  ;;  %p178_p11 = scmp.lt.s32.totalorder %s2951_s15, 1  ;;  %v2687_v1 = vld [vmem:[%s3963_s1 + $0x30] sm:$0xff]  ;;  %v2686_v2 = vld [vmem:[%s3963_s1 + $0x28] sm:$0xff]  ;;  %vm548_vm0 = vsmask.f32 7424 }
  0x15   : > { %2798 = vmatpush.bf16.msra.mxu1 %v2688_v0  ;;  %2799 = vmatpush.bf16.msra.mxu2 %v2688_v0  ;;  %v2685_v5 = vld [vmem:[%s3963_s1 + $0x20] sm:$0xff]  ;;  %v2684_v16 = vld [vmem:[%s3963_s1 + $0x18] sm:$0xff]  ;;  %v2683_v25 = vld [vmem:[%s3963_s1 + $0x10] sm:$0xff]  ;;  %vm757_vm1 = vcmask 1046528   ;;  %s175_s5 = sand.u32 1, %s2943_s13   ;;  %s2901_s28 = scalar_lea.hbm %s3965_s3, 512 }
  0x16   : > { %s179_s30 = scalar_select %p178_p11, %s2951_s15, 1  ;;  %2800 = vmatpush.bf16.msra.mxu3 %v2688_v0  ;;  %1454 = vmatpush.bf16.msra.mxu0 %v2688_v0  ;;  %v2682_v34 = vld [vmem:[%s3963_s1 + $0x8] sm:$0xff]  ;;  %v2681_v44 = vld [vmem:[%s3963_s1] sm:$0xff]  ;;  %v2704_v50 = vld [vmem:[%s3963_s1 + $0xb8] sm:$0xff] }
  0x17   : > { %v2712_v51 = vld [vmem:[%s3963_s1 + $0xf8] sm:$0xff]  ;;  %v2703_v0 = vld [vmem:[%s3963_s1 + $0xb0] sm:$0xff]  ;;  %s2386_s6 = sshll.u32 %s175_s5, 8 }
  0x18   : > { %s2822_s4 = smul.u32 216, %s179_s30  ;;  %v2696_v62 = vld [vmem:[%s3963_s1 + $0x78] sm:$0xff]  ;;  %s3828_s7 = scalar_lea.vmem [#allocation2], %s2386_s6 }
  0x19   : > { %2801 = vmatpush.bf16.msra.mxu1 %v2687_v1  ;;  %2802 = vmatpush.bf16.msra.mxu2 %v2687_v1  ;;  %v2720_v63 = vld [vmem:[%s3963_s1 + $0x138] sm:$0xff]  ;;  %s2303_s18 = sshll.u32 %s3828_s7, 4  ;;  %s2304_s18 = int_to_ptr.vmem [resolvable:$true] %s2303_s18 }
  0x1a   : > { %s3052_s9 = scalar_lea.vmem %s3962_s0, %s2822_s4  ;;  %2803 = vmatpush.bf16.msra.mxu3 %v2687_v1  ;;  %1455 = vmatpush.bf16.msra.mxu0 %v2687_v1  ;;  %v2711_v1 = vld [vmem:[%s3963_s1 + $0xf0] sm:$0xff] }
  0x1b   : > { %v2791_v3 = vld [vmem:[%s3052_s9 + $0x30] sm:$0xff]   ;;  %v2793_v4 = vld [vmem:[%s3052_s9 + $0x60] sm:$0xff]  }
  0x1c   : > { %v2795_v6 = vld [vmem:[%s3052_s9 + $0x90] sm:$0xff]   ;;  %v2755_v7 = vld [vmem:[%s3052_s9] sm:$0xff]   ;;  %v2764_v8 = vunpack.c.l.bf16 %v2791_v3  ;;  %v2765_v9 = vunpack.c.h.bf16 %v2791_v3  ;;  %v2772_v10 = vunpack.c.l.bf16 %v2793_v4  ;;  %v2773_v11 = vunpack.c.h.bf16 %v2793_v4 }
  0x1d   : > { %2804 = vmatpush.bf16.msra.mxu1 %v2686_v2  ;;  %2805 = vmatpush.bf16.msra.mxu2 %v2686_v2  ;;  %v2780_v12 = vunpack.c.l.bf16 %v2795_v6  ;;  %v2781_v13 = vunpack.c.h.bf16 %v2795_v6  ;;  %v2756_v14 = vunpack.c.l.bf16 %v2755_v7  ;;  %v2757_v15 = vunpack.c.h.bf16 %v2755_v7  ;;  %v203_v43 = vld [vmem:[%s3052_s9 + $0x3c] sm:$0xff]   ;;  %v215_v45 = vld [vmem:[%s3052_s9 + $0x6c] sm:$0xff]  }
  0x1e   : > { %2806 = vmatpush.bf16.msra.mxu3 %v2686_v2  ;;  %1456 = vmatpush.bf16.msra.mxu0 %v2686_v2  ;;  %v308_v17 = vmax.f32 %v2764_v8, 0.0  ;;  %v309_v18 = vmax.f32 %v2765_v9, 0.0  ;;  %v320_v19 = vmax.f32 %v2772_v10, 0.0  ;;  %v321_v20 = vmax.f32 %v2773_v11, 0.0  ;;  %v227_v46 = vld [vmem:[%s3052_s9 + $0x9c] sm:$0xff]   ;;  %v191_v47 = vld [vmem:[%s3052_s9 + $0xc] sm:$0xff]  }
  0x1f   : > { %v332_v21 = vmax.f32 %v2780_v12, 0.0  ;;  %v333_v22 = vmax.f32 %v2781_v13, 0.0  ;;  %v296_v23 = vmax.f32 %v2756_v14, 0.0  ;;  %v297_v24 = vmax.f32 %v2757_v15, 0.0  ;;  %v2695_v10 = vld [vmem:[%s3963_s1 + $0x70] sm:$0xff]  ;;  %v2702_v12 = vld [vmem:[%s3963_s1 + $0xa8] sm:$0xff] }
  0x20   : > { %v362_v26 = vpack.c.bf16 %v308_v17, %v308_v17  ;;  %v363_v27 = vpack.c.bf16 %v309_v18, %v309_v18  ;;  %v374_v28 = vpack.c.bf16 %v320_v19, %v320_v19  ;;  %v375_v29 = vpack.c.bf16 %v321_v20, %v321_v20  ;;  %v2719_v11 = vld [vmem:[%s3963_s1 + $0x130] sm:$0xff]  ;;  %v2710_v13 = vld [vmem:[%s3963_s1 + $0xe8] sm:$0xff] }
  0x21   : > { %2807 = vmatpush.bf16.msra.mxu1 %v2685_v5  ;;  %2808 = vmatpush.bf16.msra.mxu2 %v2685_v5  ;;  %v386_v30 = vpack.c.bf16 %v332_v21, %v332_v21  ;;  %v387_v31 = vpack.c.bf16 %v333_v22, %v333_v22  ;;  %v350_v32 = vpack.c.bf16 %v296_v23, %v296_v23  ;;  %v257_v52 = vunpack.c.l.bf16 %v203_v43  ;;  %v2694_v22 = vld [vmem:[%s3963_s1 + $0x68] sm:$0xff] }
  0x22   : > { %2809 = vmatpush.bf16.msra.mxu3 %v2685_v5  ;;  %1457 = vmatpush.bf16.msra.mxu0 %v2685_v5  ;;  %v351_v33 = vpack.c.bf16 %v297_v24, %v297_v24  ;;  %v444_v35 = vunpack.c.l.b16 %v362_v26  ;;  %v445_v36 = vunpack.c.l.b16 %v363_v27  ;;  %v452_v37 = vunpack.c.l.b16 %v374_v28  ;;  %v2718_v23 = vld [vmem:[%s3963_s1 + $0x128] sm:$0xff]  ;;  %v2701_v24 = vld [vmem:[%s3963_s1 + $0xa0] sm:$0xff] }
  0x23   : > { %v453_v38 = vunpack.c.l.b16 %v375_v29  ;;  %v460_v39 = vunpack.c.l.b16 %v386_v30  ;;  %v461_v40 = vunpack.c.l.b16 %v387_v31  ;;  %v436_v41 = vunpack.c.l.b16 %v350_v32  ;;  %v2792_v26 = vld [vmem:[%s3052_s9 + $0x48] sm:$0xff]   ;;  %v2794_v31 = vld [vmem:[%s3052_s9 + $0x78] sm:$0xff]  }
  0x24   : > { %v437_v42 = vunpack.c.l.b16 %v351_v33  ;;  %v3077_v48 = vpack.c.b16 %v445_v36, %v444_v35  ;;  %v258_v53 = vunpack.c.h.bf16 %v203_v43  ;;  %v269_v56 = vunpack.c.l.bf16 %v215_v45  ;;  %v2796_v36 = vld [vmem:[%s3052_s9 + $0xa8] sm:$0xff]  }
  0x25   : > { %2810 = vmatpush.bf16.msra.mxu1 %v2684_v16  ;;  %2811 = vmatpush.bf16.msra.mxu2 %v2684_v16  ;;  %v3079_v49 = vpack.c.b16 %v453_v38, %v452_v37  ;;  %v3087_v54 = vpack.c.b16 %v461_v40, %v460_v39  ;;  %v270_v57 = vunpack.c.h.bf16 %v215_v45  ;;  %v281_v58 = vunpack.c.l.bf16 %v227_v46  ;;  %v2693_v37 = vld [vmem:[%s3963_s1 + $0x60] sm:$0xff]  ;;  %v2790_v39 = vld [vmem:[%s3052_s9 + $0x18] sm:$0xff]  }
  0x26   : > { %2812 = vmatpush.bf16.msra.mxu3 %v2684_v16  ;;  %1458 = vmatpush.bf16.msra.mxu0 %v2684_v16  ;;  %v3089_v55 = vpack.c.b16 %v437_v42, %v436_v41  ;;  %v282_v59 = vunpack.c.h.bf16 %v227_v46  ;;  %v245_v60 = vunpack.c.l.bf16 %v191_v47  ;;  %v246_v61 = vunpack.c.h.bf16 %v191_v47  ;;  %v2717_v40 = vld [vmem:[%s3963_s1 + $0x120] sm:$0xff]  ;;  %v2708_v45 = vld [vmem:[%s3963_s1 + $0xd8] sm:$0xff] }
  0x27   : > { %3991 = vst [vmem:[#allocation5_spill] sm:$0xff] %v3079_v49  ;;  %v311_v2 = vmax.f32 %v257_v52, 0.0  ;;  %v312_v3 = vmax.f32 %v258_v53, 0.0  ;;  %v323_v4 = vmax.f32 %v269_v56, 0.0  ;;  %v324_v5 = vmax.f32 %v270_v57, 0.0 }
  0x28   : > { %v335_v6 = vmax.f32 %v281_v58, 0.0  ;;  %v336_v7 = vmax.f32 %v282_v59, 0.0  ;;  %v299_v8 = vmax.f32 %v245_v60, 0.0  ;;  %v300_v9 = vmax.f32 %v246_v61, 0.0  ;;  %v2692_v59 = vld [vmem:[%s3963_s1 + $0x58] sm:$0xff] }
  0x29   : > { %2813 = vmatpush.bf16.msra.mxu1 %v2683_v25  ;;  %2814 = vmatpush.bf16.msra.mxu2 %v2683_v25  ;;  %v365_v14 = vpack.c.bf16 %v311_v2, %v311_v2  ;;  %v366_v15 = vpack.c.bf16 %v312_v3, %v312_v3  ;;  %v377_v16 = vpack.c.bf16 %v323_v4, %v323_v4  ;;  %v2768_v38 = vunpack.c.l.bf16 %v2792_v26  ;;  %v2716_v60 = vld [vmem:[%s3963_s1 + $0x118] sm:$0xff] }
  0x2a   : > { %2815 = vmatpush.bf16.msra.mxu3 %v2683_v25  ;;  %1459 = vmatpush.bf16.msra.mxu0 %v2683_v25  ;;  %v378_v17 = vpack.c.bf16 %v324_v5, %v324_v5  ;;  %v389_v18 = vpack.c.bf16 %v335_v6, %v335_v6  ;;  %v390_v19 = vpack.c.bf16 %v336_v7, %v336_v7  ;;  %v2709_v25 = vld [vmem:[%s3963_s1 + $0xe0] sm:$0xff]  ;;  %v2769_v41 = vunpack.c.h.bf16 %v2792_v26  ;;  %v2691_v7 = vld [vmem:[%s3963_s1 + $0x50] sm:$0xff] }
  0x2b   : > { %v353_v20 = vpack.c.bf16 %v299_v8, %v299_v8  ;;  %v354_v21 = vpack.c.bf16 %v300_v9, %v300_v9  ;;  %v446_v27 = vunpack.c.l.b16 %v365_v14  ;;  %v447_v28 = vunpack.c.l.b16 %v366_v15  ;;  %v2715_v8 = vld [vmem:[%s3963_s1 + $0x110] sm:$0xff] }
  0x2c   : > { %v454_v29 = vunpack.c.l.b16 %v377_v16  ;;  %v455_v30 = vunpack.c.l.b16 %v378_v17  ;;  %v462_v32 = vunpack.c.l.b16 %v389_v18  ;;  %v463_v33 = vunpack.c.l.b16 %v390_v19  ;;  %v2690_v18 = vld [vmem:[%s3963_s1 + $0x48] sm:$0xff] }
  0x2d   : > { %2816 = vmatpush.bf16.msra.mxu1 %v2682_v34  ;;  %2817 = vmatpush.bf16.msra.mxu2 %v2682_v34  ;;  %v439_v35 = vunpack.c.l.b16 %v354_v21  ;;  %v2776_v42 = vunpack.c.l.bf16 %v2794_v31  ;;  %v2777_v43 = vunpack.c.h.bf16 %v2794_v31  ;;  %v3147_v46 = vpack.c.b16 %v447_v28, %v446_v27  ;;  %v2714_v19 = vld [vmem:[%s3963_s1 + $0x108] sm:$0xff]  ;;  %v209_v28 = vld [vmem:[%s3052_s9 + $0x54] sm:$0xff]  }
  0x2e   : > { %2818 = vmatpush.bf16.msra.mxu3 %v2682_v34  ;;  %1460 = vmatpush.bf16.msra.mxu0 %v2682_v34  ;;  %v438_v34 = vunpack.c.l.b16 %v353_v20  ;;  %v3149_v47 = vpack.c.b16 %v455_v30, %v454_v29  ;;  %v3151_v52 = vpack.c.b16 %v463_v33, %v462_v32  ;;  %v2760_v56 = vunpack.c.l.bf16 %v2790_v39  ;;  %v221_v31 = vld [vmem:[%s3052_s9 + $0x84] sm:$0xff]   ;;  %v233_v32 = vld [vmem:[%s3052_s9 + $0xb4] sm:$0xff]  }
  0x2f   : > { %v2761_v57 = vunpack.c.h.bf16 %v2790_v39  ;;  %v314_v58 = vmax.f32 %v2768_v38, 0.0  ;;  %v315_v61 = vmax.f32 %v2769_v41, 0.0  ;;  %v197_v33 = vld [vmem:[%s3052_s9 + $0x24] sm:$0xff]   ;;  %v263_v38 = vunpack.c.l.bf16 %v209_v28 }
  0x30   : > { %3992 = vst [vmem:[#allocation6_spill] sm:$0xff] %v3151_v52  ;;  %v3153_v53 = vpack.c.b16 %v439_v35, %v438_v34  ;;  %v302_v4 = vmax.f32 %v2760_v56, 0.0  ;;  %v2689_v34 = vld [vmem:[%s3963_s1 + $0x40] sm:$0xff]  ;;  %v264_v39 = vunpack.c.h.bf16 %v209_v28  ;;  %v275_v41 = vunpack.c.l.bf16 %v221_v31  ;;  %v190_v56 = vld [vmem:[%s3052_s9 + $0x8] sm:$0x1] }
  0x31   : > { %2819 = vmatpush.bf16.msra.mxu1 %v2681_v44  ;;  %2820 = vmatpush.bf16.msra.mxu2 %v2681_v44  ;;  %v303_v5 = vmax.f32 %v2761_v57, 0.0  ;;  %v368_v6 = vpack.c.bf16 %v314_v58, %v314_v58  ;;  %v369_v9 = vpack.c.bf16 %v315_v61, %v315_v61  ;;  %v2713_v35 = vld [vmem:[%s3963_s1 + $0x100] sm:$0xff]  ;;  %v317_v57 = vmax.f32 %v263_v38, 0.0 }
  0x32   : > { %2821 = vmatpush.bf16.msra.mxu3 %v2681_v44  ;;  %1461 = vmatpush.bf16.msra.mxu0 %v2681_v44  ;;  %v2700_v44 = vld [vmem:[%s3963_s1 + $0x98] sm:$0xff]  ;;  %v356_v16 = vpack.c.bf16 %v302_v4, %v302_v4  ;;  %v318_v58 = vmax.f32 %v264_v39, 0.0  ;;  %v552_v38 = vshll.u32 %v3089_v55, 16 }
  0x33   : > { %v357_v17 = vpack.c.bf16 %v303_v5, %v303_v5  ;;  %v448_v20 = vunpack.c.l.b16 %v368_v6  ;;  %v449_v21 = vunpack.c.l.b16 %v369_v9  ;;  %v2744_v4 = vld [vmem:[%s3963_s1 + $0x1f8] sm:$0xff] }
  0x34   : > { %1482 = vmatmul.bf16.vlgmr.msra.gmra.mxu1 %v3077_v48  ;;  %1502 = vmatmul.bf16.vlgmr.msra.gmra.mxu2 %v3079_v49  ;;  %v440_v29 = vunpack.c.l.b16 %v356_v16  ;;  %v2728_v5 = vld [vmem:[%s3963_s1 + $0x178] sm:$0xff]  ;;  %v372_v9 = vpack.c.bf16 %v318_v58, %v318_v58 }
  0x35   : > { %1632 = vmatpush.bf16.msrb.mxu2 %v2704_v50  ;;  %1522 = vmatmul.bf16.vlgmr.msra.gmra.mxu3 %v3087_v54  ;;  %v2784_v50 = vunpack.c.l.bf16 %v2796_v36  ;;  %v441_v30 = vunpack.c.l.b16 %v357_v17 }
  0x36   : > { %1721 = vmatpush.bf16.msrb.mxu3 %v2712_v51  ;;  %1462 = vmatmul.bf16.vlgmr.msra.gmra.mxu0 %v3089_v55  ;;  %v2785_v51 = vunpack.c.h.bf16 %v2796_v36  ;;  %v3205_v36 = vpack.c.b16 %v449_v21, %v448_v20 }
  0x37   : > { %1543 = vmatpush.bf16.msrb.mxu1 %v2696_v62  ;;  %1810 = vmatpush.bf16.msrb.mxu0 %v2720_v63  ;;  %v326_v62 = vmax.f32 %v2776_v42, 0.0  ;;  %v327_v63 = vmax.f32 %v2777_v43, 0.0  ;;  %v338_v2 = vmax.f32 %v2784_v50, 0.0  ;;  %v276_v42 = vunpack.c.h.bf16 %v221_v31 }
  0x38   : > { %v339_v3 = vmax.f32 %v2785_v51, 0.0  ;;  %3993 = vst [vmem:[#allocation7_spill] sm:$0xff] %v3205_v36  ;;  %v287_v43 = vunpack.c.l.bf16 %v233_v32  ;;  %v251_v50 = vunpack.c.l.bf16 %v197_v33  ;;  %v252_v51 = vunpack.c.h.bf16 %v197_v33 }
  0x39   : > { %1633 = vmatpush.bf16.msrb.mxu2 %v2703_v0  ;;  %v2699_v0 = vld [vmem:[%s3963_s1 + $0x90] sm:$0xff]  ;;  %v392_v14 = vpack.c.bf16 %v338_v2, %v338_v2  ;;  %v330_v61 = vmax.f32 %v276_v42, 0.0  ;;  %v244_v2 = vunpack.c.l.bf16 %v190_v56 }
  0x3a   : > { %1722 = vmatpush.bf16.msrb.mxu3 %v2711_v1  ;;  %v2707_v1 = vld [vmem:[%s3963_s1 + $0xd0] sm:$0xff]  ;;  %v393_v15 = vpack.c.bf16 %v339_v3, %v339_v3  ;;  %v2736_v3 = vld [vmem:[%s3963_s1 + $0x1b8] sm:$0xff] }
  0x3b   : > { %1544 = vmatpush.bf16.msrb.mxu1 %v2695_v10  ;;  %1811 = vmatpush.bf16.msrb.mxu0 %v2719_v11  ;;  %v380_v10 = vpack.c.bf16 %v326_v62, %v326_v62  ;;  %v381_v11 = vpack.c.bf16 %v327_v63, %v327_v63  ;;  %v464_v26 = vunpack.c.l.b16 %v392_v14  ;;  %v341_v62 = vmax.f32 %v287_v43, 0.0 }
  0x3c   : > { %v465_v27 = vunpack.c.l.b16 %v393_v15  ;;  %v298_v16 = vmax.f32 %v244_v2, 0.0  ;;  %v550_v43 = vshrl.u32 %v3089_v55, 16 }
  0x3d   : > { %1634 = vmatpush.bf16.msrb.mxu2 %v2702_v12  ;;  %v2698_v12 = vld [vmem:[%s3963_s1 + $0x88] sm:$0xff] }
  0x3e   : > { %1723 = vmatpush.bf16.msrb.mxu3 %v2710_v13  ;;  %v2706_v13 = vld [vmem:[%s3963_s1 + $0xc8] sm:$0xff] }
  0x3f   : > { %1545 = vmatpush.bf16.msrb.mxu1 %v2694_v22  ;;  %1812 = vmatpush.bf16.msrb.mxu0 %v2718_v23  ;;  %v456_v22 = vunpack.c.l.b16 %v380_v10  ;;  %v457_v23 = vunpack.c.l.b16 %v381_v11  ;;  %v384_v11 = vpack.c.bf16 %v330_v61, %v330_v61  ;;  %v758_v61 = vrot.slane %v3089_v55, 1  ;;  %v2735_v55 = vld [vmem:[%s3963_s1 + $0x1b0] sm:$0xff] }
  0x41   : > { %1635 = vmatpush.bf16.msrb.mxu2 %v2701_v24  ;;  %v2697_v24 = vld [vmem:[%s3963_s1 + $0x80] sm:$0xff]  ;;  %v459_v21 = vunpack.c.l.b16 %v384_v11 }
  0x42   : > { %1724 = vmatpush.bf16.msrb.mxu3 %v2709_v25  ;;  %v2705_v25 = vld [vmem:[%s3963_s1 + $0xc0] sm:$0xff] }
  0x43   : > { %1546 = vmatpush.bf16.msrb.mxu1 %v2693_v37  ;;  %1813 = vmatpush.bf16.msrb.mxu0 %v2717_v40  ;;  %v3207_v37 = vpack.c.b16 %v457_v23, %v456_v22  ;;  %v3209_v40 = vpack.c.b16 %v465_v27, %v464_v26  ;;  %v352_v26 = vpack.c.bf16 %v298_v16, %v298_v16 }
  0x44   : > { %1487 = vmatmul.bf16.gmra.mxu1 %v3147_v46  ;;  %1507 = vmatmul.bf16.gmra.mxu2 %v3149_v47 }
  0x45   : > { %1636 = vmatpush.bf16.msrb.mxu2 %v2700_v44  ;;  %1527 = vmatmul.bf16.gmra.mxu3 %v3151_v52  ;;  %v3211_v44 = vpack.c.b16 %v441_v30, %v440_v29 }
  0x46   : > { %1725 = vmatpush.bf16.msrb.mxu3 %v2708_v45  ;;  %1467 = vmatmul.bf16.gmra.mxu0 %v3153_v53  ;;  %v288_v45 = vunpack.c.h.bf16 %v233_v32  ;;  %v516_v32 = vunpack.c.l.b16 %v352_v26 }
  0x47   : > { %1547 = vmatpush.bf16.msrb.mxu1 %v2692_v59  ;;  %1814 = vmatpush.bf16.msrb.mxu0 %v2716_v60  ;;  %v193_v59 = vld [vmem:[%s3052_s9 + $0x14] sm:$0x1]  ;;  %v329_v60 = vmax.f32 %v275_v41, 0.0  ;;  %v564_v41 = vshll.u32 %v3153_v53, 16 }
  0x48   : > { %v342_v63 = vmax.f32 %v288_v45, 0.0  ;;  %v247_v6 = vunpack.c.l.bf16 %v193_v59  ;;  %v554_v45 = vrot.slane %v552_v38, 1  ;;  %v764_v38 = vrot.slane %v3211_v44, 1 }
  0x49   : > { %1637 = vmatpush.bf16.msrb.mxu2 %v2699_v0  ;;  %v305_v0 = vmax.f32 %v251_v50, 0.0  ;;  %v383_v10 = vpack.c.bf16 %v329_v60, %v329_v60  ;;  %v566_v56 = vrot.slane %v564_v41, 1 }
  0x4a   : > { %1726 = vmatpush.bf16.msrb.mxu3 %v2707_v1  ;;  %v306_v1 = vmax.f32 %v252_v51, 0.0  ;;  %v301_v17 = vmax.f32 %v247_v6, 0.0  ;;  %v562_v51 = vshrl.u32 %v3153_v53, 16  ;;  %v555_v59 = vor.u32 %v554_v45, %v550_v43  ;;  %v199_v6 = vld [vmem:[%s3052_s9 + $0x2c] sm:$0x1] }
  0x4b   : > { %1548 = vmatpush.bf16.msrb.mxu1 %v2691_v7  ;;  %1815 = vmatpush.bf16.msrb.mxu0 %v2715_v8  ;;  %v2752_v7 = vld [vmem:[%s3963_s1 + $0x238] sm:$0xff]  ;;  %v371_v8 = vpack.c.bf16 %v317_v57, %v317_v57  ;;  %v359_v14 = vpack.c.bf16 %v305_v0, %v305_v0  ;;  %v458_v20 = vunpack.c.l.b16 %v383_v10  ;;  %v576_v10 = vshll.u32 %v3211_v44, 16 }
  0x4c   : > { %v360_v15 = vpack.c.bf16 %v306_v1, %v306_v1  ;;  %v355_v27 = vpack.c.bf16 %v301_v17, %v301_v17  ;;  %v253_v11 = vunpack.c.l.bf16 %v199_v6  ;;  %v761_v17 = vrot.slane %v3153_v53, 1 }
  0x4d   : > { %1638 = vmatpush.bf16.msrb.mxu2 %v2698_v12  ;;  %v395_v12 = vpack.c.bf16 %v341_v62, %v341_v62  ;;  %v3233_v29 = vpack.c.b16 %v459_v21, %v458_v20 }
  0x4e   : > { %1727 = vmatpush.bf16.msrb.mxu3 %v2706_v13  ;;  %v396_v13 = vpack.c.bf16 %v342_v63, %v342_v63  ;;  %v517_v33 = vunpack.c.l.b16 %v355_v27  ;;  %v567_v63 = vor.u32 %v566_v56, %v562_v51  ;;  %v307_v16 = vmax.f32 %v253_v11, 0.0  ;;  %v205_v56 = vld [vmem:[%s3052_s9 + $0x44] sm:$0x1]  ;;  %v208_v11 = vld [vmem:[%s3052_s9 + $0x50] sm:$0x1] }
  0x4f   : > { %1549 = vmatpush.bf16.msrb.mxu1 %v2690_v18  ;;  %1816 = vmatpush.bf16.msrb.mxu0 %v2714_v19  ;;  %v450_v18 = vunpack.c.l.b16 %v371_v8  ;;  %v451_v19 = vunpack.c.l.b16 %v372_v9  ;;  %v466_v22 = vunpack.c.l.b16 %v395_v12  ;;  %v2727_v8 = vld [vmem:[%s3963_s1 + $0x170] sm:$0xff] }
  0x50   : > { %v467_v23 = vunpack.c.l.b16 %v396_v13  ;;  %v533_v39 = vpack.c.b16 %v517_v33, %v517_v33  ;;  %v2751_v12 = vld [vmem:[%s3963_s1 + $0x230] sm:$0xff]  ;;  %v574_v13 = vshrl.u32 %v3211_v44, 16  ;;  %v361_v21 = vpack.c.bf16 %v307_v16, %v307_v16 }
  0x51   : > { %1639 = vmatpush.bf16.msrb.mxu2 %v2697_v24  ;;  %v442_v24 = vunpack.c.l.b16 %v359_v14  ;;  %v3231_v28 = vpack.c.b16 %v451_v19, %v450_v18  ;;  %v578_v14 = vrot.slane %v576_v10, 1 }
  0x52   : > { %1728 = vmatpush.bf16.msrb.mxu3 %v2705_v25  ;;  %v443_v25 = vunpack.c.l.b16 %v360_v15  ;;  %v3235_v30 = vpack.c.b16 %v467_v23, %v466_v22  ;;  %v569_v57 = vshll.u32 %v533_v39, 16  ;;  %v762_v18 = vrot.slane %v533_v39, 1 }
  0x53   : > { %1550 = vmatpush.bf16.msrb.mxu1 %v2689_v34  ;;  %1817 = vmatpush.bf16.msrb.mxu0 %v2713_v35  ;;  %3994 = vst [vmem:[#allocation8_spill] sm:$0xff] %v3231_v28  ;;  %v196_v34 = vld [vmem:[%s3052_s9 + $0x20] sm:$0x1]  ;;  %v532_v35 = vpack.c.b16 %v516_v32, %v516_v32  ;;  %v579_v19 = vor.u32 %v578_v14, %v574_v13  ;;  %v612_v13 = vshll.u32 %v3147_v46, 16  ;;  %v262_v14 = vunpack.c.l.bf16 %v208_v11 }
  0x54   : > { %1492 = vmatmul.bf16.gmra.mxu1 %v3205_v36  ;;  %1512 = vmatmul.bf16.gmra.mxu2 %v3207_v37  ;;  %v3237_v31 = vpack.c.b16 %v443_v25, %v442_v24  ;;  %v250_v42 = vunpack.c.l.bf16 %v196_v34  ;;  %v571_v0 = vrot.slane %v569_v57, 1  ;;  %v3270_v22 = vsel %vm757_vm1, %v761_v17, %v762_v18  ;;  %v202_v25 = vld [vmem:[%s3052_s9 + $0x38] sm:$0x1]  ;;  %v2734_v57 = vld [vmem:[%s3963_s1 + $0x1a8] sm:$0xff] }
  0x55   : > { %1532 = vmatmul.bf16.gmra.mxu3 %v3209_v40  ;;  %1988 = vmatpush.bf16.msra.mxu2 %v2736_v3  ;;  %v557_v50 = vshll.u32 %v532_v35, 16  ;;  %v759_v62 = vrot.slane %v532_v35, 1  ;;  %v519_v24 = vunpack.c.l.b16 %v361_v21  ;;  %v256_v27 = vunpack.c.l.bf16 %v202_v25  ;;  %v3325_v21 = vld [vmem:[%s3964_s2] ss:$0 sm:$0xff] }
  0x56   : > { %1472 = vmatmul.bf16.gmra.mxu0 %v3211_v44  ;;  %2077 = vmatpush.bf16.msra.mxu3 %v2744_v4  ;;  %v304_v58 = vmax.f32 %v250_v42, 0.0  ;;  %v572_v4 = vsel %vm548_vm0, %v567_v63, %v571_v0  ;;  %v588_v26 = vshll.u32 %v3237_v31, 16  ;;  %v586_v32 = vshrl.u32 %v3237_v31, 16 }
  0x57   : > { %1899 = vmatpush.bf16.msra.mxu1 %v2728_v5  ;;  %2166 = vmatpush.bf16.msra.mxu0 %v2752_v7  ;;  %v559_v60 = vrot.slane %v557_v50, 1  ;;  %v760_v3 = vsel %vm757_vm1, %v758_v61, %v759_v62  ;;  %v2743_v7 = vld [vmem:[%s3963_s1 + $0x1f0] sm:$0xff]  ;;  %v310_v35 = vmax.f32 %v256_v27, 0.0  ;;  %v259_v61 = vunpack.c.l.bf16 %v205_v56  ;;  %v2726_v62 = vld [vmem:[%s3963_s1 + $0x168] sm:$0xff] }
  0x58   : > { %v358_v1 = vpack.c.bf16 %v304_v58, %v304_v58  ;;  %v590_v33 = vrot.slane %v588_v26, 1  ;;  %v2742_v58 = vld [vmem:[%s3963_s1 + $0x1e8] sm:$0xff]  ;;  %v598_v63 = vshrl.u32 %v3077_v48, 16  ;;  %v614_v16 = vrot.slane %v612_v13, 1 }
  0x59   : > { %v560_v2 = vsel %vm548_vm0, %v555_v59, %v559_v60  ;;  %1989 = vmatpush.bf16.msra.mxu2 %v2735_v55  ;;  %v364_v43 = vpack.c.bf16 %v310_v35, %v310_v35  ;;  %v600_v60 = vshll.u32 %v3077_v48, 16  ;;  %v316_v18 = vmax.f32 %v262_v14, 0.0 }
  0x5a   : > { %v518_v5 = vunpack.c.l.b16 %v358_v1  ;;  %2078 = vmatpush.bf16.msra.mxu3 %v2743_v7  ;;  %v591_v41 = vor.u32 %v590_v33, %v586_v32 }
  0x5b   : > { %1900 = vmatpush.bf16.msra.mxu1 %v2727_v8  ;;  %2167 = vmatpush.bf16.msra.mxu0 %v2751_v12  ;;  %v520_v51 = vunpack.c.l.b16 %v364_v43  ;;  %v602_v0 = vrot.slane %v600_v60, 1  ;;  %v624_v43 = vshll.u32 %v3205_v36, 16 }
  0x5c   : > { %v534_v9 = vpack.c.b16 %v518_v5, %v518_v5 }
  0x5d   : > { %v536_v59 = vpack.c.b16 %v520_v51, %v520_v51  ;;  %1990 = vmatpush.bf16.msra.mxu2 %v2734_v57  ;;  %v603_v6 = vor.u32 %v602_v0, %v598_v63 }
  0x5e   : > { %v581_v15 = vshll.u32 %v534_v9, 16  ;;  %v765_v39 = vrot.slane %v534_v9, 1  ;;  %2079 = vmatpush.bf16.msra.mxu3 %v2742_v58 }
  0x5f   : > { %v605_v1 = vshll.u32 %v536_v59, 16  ;;  %1901 = vmatpush.bf16.msra.mxu1 %v2726_v62  ;;  %v2725_v62 = vld [vmem:[%s3963_s1 + $0x160] sm:$0xff] }
  0x60   : > { %v583_v20 = vrot.slane %v581_v15, 1  ;;  %v3283_v45 = vsel %vm757_vm1, %v764_v38, %v765_v39  ;;  %v610_v15 = vshrl.u32 %v3147_v46, 16  ;;  %v211_v38 = vld [vmem:[%s3052_s9 + $0x5c] sm:$0x1]  ;;  %v2733_v39 = vld [vmem:[%s3963_s1 + $0x1a0] sm:$0xff] }
  0x61   : > { %v607_v55 = vrot.slane %v605_v1, 1  ;;  %v265_v51 = vunpack.c.l.bf16 %v211_v38  ;;  %1991 = vmatpush.bf16.msra.mxu2 %v2733_v39  ;;  %v626_v1 = vrot.slane %v624_v43, 1 }
  0x62   : > { %v3273_v23 = vsel %vm548_vm0, %v579_v19, %v583_v20  ;;  %v770_v19 = vrot.slane %v3077_v48, 1  ;;  %v771_v20 = vrot.slane %v536_v59, 1 }
  0x63   : > { %v3312_v9 = vsel %vm548_vm0, %v603_v6, %v607_v55  ;;  %1902 = vmatpush.bf16.msra.mxu1 %v2725_v62 }
  0x64   : > { %1497 = vmatmul.bf16.gmra.mxu1 %v3231_v28  ;;  %1517 = vmatmul.bf16.gmra.mxu2 %v3233_v29  ;;  %v3328_v27 = vsel %vm757_vm1, %v770_v19, %v771_v20 }
  0x65   : > { %1537 = vmatmul.bf16.gmra.mxu3 %v3235_v30 }
  0x66   : > { %1477 = vmatmul.bf16.gmra.mxu0 %v3237_v31 }
  0x74   : > { %1551 = vmatmul.bf16.vlgmr.msrb.gmra.mxu1 %v560_v2  ;;  %1640 = vmatmul.bf16.vlgmr.msrb.gmra.mxu2 %v760_v3  ;;  %v313_v2 = vmax.f32 %v259_v61, 0.0  ;;  %v2750_v3 = vld [vmem:[%s3963_s1 + $0x228] sm:$0xff]  ;;  %v622_v61 = vshrl.u32 %v3205_v36, 16 }
  0x75   : > { %1729 = vmatmul.bf16.vlgmr.msrb.gmra.mxu3 %v3153_v53  ;;  %v535_v53 = vpack.c.b16 %v519_v24, %v519_v24  ;;  %2168 = vmatpush.bf16.msra.mxu0 %v2750_v3  ;;  %v615_v24 = vor.u32 %v614_v16, %v610_v15  ;;  %v319_v3 = vmax.f32 %v265_v51, 0.0  ;;  %v634_v51 = vshrl.u32 %v3231_v28, 16 }
  0x76   : > { %1818 = vmatmul.bf16.vlgmr.msrb.gmra.mxu0 %v572_v4  ;;  %v367_v7 = vpack.c.bf16 %v313_v2, %v313_v2  ;;  %v627_v55 = vor.u32 %v626_v1, %v622_v61  ;;  %v776_v1 = vrot.slane %v3205_v36, 1 }
  0x77   : > { %v593_v34 = vshll.u32 %v535_v53, 16  ;;  %v768_v5 = vrot.slane %v535_v53, 1  ;;  %v370_v53 = vpack.c.bf16 %v316_v18, %v316_v18 }
  0x78   : > { %v521_v10 = vunpack.c.l.b16 %v367_v7 }
  0x79   : > { %v595_v42 = vrot.slane %v593_v34, 1  ;;  %v522_v35 = vunpack.c.l.b16 %v370_v53  ;;  %v636_v53 = vshll.u32 %v3231_v28, 16 }
  0x7a   : > { %v537_v12 = vpack.c.b16 %v521_v10, %v521_v10  ;;  %v373_v10 = vpack.c.bf16 %v319_v3, %v319_v3 }
  0x7b   : > { %v3286_v50 = vsel %vm548_vm0, %v591_v41, %v595_v42  ;;  %v2741_v41 = vld [vmem:[%s3963_s1 + $0x1e0] sm:$0xff]  ;;  %v3349_v42 = vpack.c.b16 %v522_v35, %v522_v35 }
  0x7c   : > { %v617_v17 = vshll.u32 %v537_v12, 16  ;;  %2080 = vmatpush.bf16.msra.mxu3 %v2741_v41  ;;  %v774_v6 = vrot.slane %v537_v12, 1  ;;  %v523_v20 = vunpack.c.l.b16 %v373_v10 }
  0x7d   : > { %v629_v2 = vshll.u32 %v3349_v42, 16 }
  0x7e   : > { %v619_v25 = vrot.slane %v617_v17, 1 }
  0x7f   : > { %v631_v7 = vrot.slane %v629_v2, 1  ;;  %v777_v2 = vrot.slane %v3349_v42, 1 }
  0x80   : > { %v3336_v34 = vsel %vm548_vm0, %v615_v24, %v619_v25  ;;  %v214_v24 = vld [vmem:[%s3052_s9 + $0x68] sm:$0x1]  ;;  %v3394_v25 = vpack.c.b16 %v523_v20, %v523_v20 }
  0x81   : > { %3995 = vst [vmem:[#allocation9_spill] sm:$0xff] %v3336_v34  ;;  %v3387_v19 = vsel %vm548_vm0, %v627_v55, %v631_v7 }
  0x82   : > { %3999 = vst [vmem:[#allocation13_spill] sm:$0xff] %v3387_v19  ;;  %v641_v61 = vshll.u32 %v3394_v25, 16 }
  0x84   : > { %1556 = vmatmul.bf16.gmra.mxu1 %v572_v4  ;;  %1645 = vmatmul.bf16.gmra.mxu2 %v3270_v22  ;;  %v767_v4 = vrot.slane %v3237_v31, 1 }
  0x85   : > { %1734 = vmatmul.bf16.gmra.mxu3 %v3211_v44 }
  0x86   : > { %1823 = vmatmul.bf16.gmra.mxu0 %v3273_v23  ;;  %v3309_v8 = vsel %vm757_vm1, %v767_v4, %v768_v5  ;;  %v2749_v4 = vld [vmem:[%s3963_s1 + $0x220] sm:$0xff]  ;;  %v773_v5 = vrot.slane %v3147_v46, 1 }
  0x87   : > { %2169 = vmatpush.bf16.msra.mxu0 %v2749_v4  ;;  %v643_v4 = vrot.slane %v641_v61, 1 }
  0x88   : > { %v3379_v17 = vsel %vm757_vm1, %v773_v5, %v774_v6 }
  0x89   : > { %3998 = vst [vmem:[#allocation12_spill] sm:$0xff] %v3379_v17 }
  0x94   : > { %1561 = vmatmul.bf16.gmra.mxu1 %v3273_v23  ;;  %1650 = vmatmul.bf16.gmra.mxu2 %v3283_v45 }
  0x95   : > { %1739 = vmatmul.bf16.gmra.mxu3 %v3237_v31 }
  0x96   : > { %1828 = vmatmul.bf16.gmra.mxu0 %v3286_v50 }
  0xa4   : > { %1566 = vmatmul.bf16.gmra.mxu1 %v3286_v50  ;;  %1655 = vmatmul.bf16.gmra.mxu2 %v3309_v8 }
  0xa5   : > { %1744 = vmatmul.bf16.gmra.mxu3 %v3077_v48 }
  0xa6   : > { %1833 = vmatmul.bf16.gmra.mxu0 %v3312_v9 }
  0xb1   : > { %v1483_v26 = vpop.f32.mrf.mxu1 }
  0xb2   : > { %v3331_v32 = vadd.f32 %v3325_v21, %v1483_v26  ;;  %v268_v26 = vunpack.c.l.bf16 %v214_v24 }
  0xb3   : > { %v3333_v33 = vpop.f32.mrf.mxu0 }
  0xb4   : > { %1571 = vmatmul.bf16.gmra.mxu1 %v3312_v9  ;;  %1660 = vmatmul.bf16.gmra.mxu2 %v3328_v27  ;;  %v322_v62 = vmax.f32 %v268_v26, 0.0  ;;  %v2732_v26 = vld [vmem:[%s3963_s1 + $0x198] sm:$0xff] }
  0xb5   : > { %1749 = vmatmul.bf16.gmra.mxu3 %v3147_v46  ;;  %1992 = vmatpush.bf16.msra.mxu2 %v2732_v26  ;;  %v779_v26 = vrot.slane %v3231_v28, 1 }
  0xb6   : > { %1838 = vmatmul.bf16.gmra.mxu0 %v3336_v34  ;;  %v376_v5 = vpack.c.bf16 %v322_v62, %v322_v62 }
  0xb7   : > { %v1503_v56 = vpop.f32.mrf.mxu2 }
  0xb8   : > { %v3353_v57 = vadd.f32 %v3325_v21, %v1503_v56  ;;  %v1523_v58 = vpop.f32.mrf.mxu3  ;;  %v524_v24 = vunpack.c.l.b16 %v376_v5 }
  0xb9   : > { %v3356_v59 = vadd.f32 %v3325_v21, %v1523_v58  ;;  %v1485_v60 = vpop.f32.mrf.mxu1 }
  0xba   : > { %v3363_v63 = vadd.f32 %v3325_v21, %v1485_v60  ;;  %v638_v60 = vrot.slane %v636_v53, 1  ;;  %v217_v53 = vld [vmem:[%s3052_s9 + $0x74] sm:$0x1] }
  0xbb   : > { %3996 = vst [vmem:[#allocation10_spill] sm:$0xff] %v3356_v59  ;;  %v3365_v0 = vpop.f32.mrf.mxu0 }
  0xbc   : > { %v639_v3 = vor.u32 %v638_v60, %v634_v51  ;;  %v271_v51 = vunpack.c.l.bf16 %v217_v53  ;;  %v2748_v53 = vld [vmem:[%s3963_s1 + $0x218] sm:$0xff] }
  0xbd   : > { %2170 = vmatpush.bf16.msra.mxu0 %v2748_v53 }
  0xbe   : > { %v3427_v42 = vsel %vm548_vm0, %v639_v3, %v643_v4  ;;  %v646_v3 = vshrl.u32 %v3079_v49, 16 }
  0xbf   : > { %v1505_v11 = vpop.f32.mrf.mxu2  ;;  %4003 = vst [vmem:[#allocation17_spill] sm:$0xff] %v3427_v42 }
  0xc0   : > { %v3373_v13 = vadd.f32 %v3325_v21, %v1505_v11  ;;  %v1525_v14 = vpop.f32.mrf.mxu3 }
  0xc1   : > { %v3376_v15 = vadd.f32 %v3325_v21, %v1525_v14  ;;  %v1488_v16 = vpop.f32.mrf.mxu1  ;;  %v3419_v14 = vsel %vm757_vm1, %v776_v1, %v777_v2 }
  0xc2   : > { %v3382_v18 = vadd.f32 %v3325_v21, %v1488_v16  ;;  %4002 = vst [vmem:[#allocation16_spill] sm:$0xff] %v3419_v14 }
  0xc3   : > { %3997 = vst [vmem:[#allocation11_spill] sm:$0xff] %v3376_v15  ;;  %v3384_v12 = vpop.f32.mrf.mxu0 }
  0xc4   : > { %1576 = vmatmul.bf16.gmra.mxu1 %v3336_v34  ;;  %1665 = vmatmul.bf16.gmra.mxu2 %v3379_v17 }
  0xc5   : > { %1754 = vmatmul.bf16.gmra.mxu3 %v3205_v36 }
  0xc6   : > { %1843 = vmatmul.bf16.gmra.mxu0 %v3387_v19 }
  0xc7   : > { %v1508_v35 = vpop.f32.mrf.mxu2 }
  0xc8   : > { %v3398_v38 = vadd.f32 %v3325_v21, %v1508_v35  ;;  %v1528_v39 = vpop.f32.mrf.mxu3  ;;  %v2740_v35 = vld [vmem:[%s3963_s1 + $0x1d8] sm:$0xff] }
  0xc9   : > { %v3401_v41 = vadd.f32 %v3325_v21, %v1528_v39  ;;  %v1490_v43 = vpop.f32.mrf.mxu1  ;;  %v3440_v39 = vpack.c.b16 %v524_v24, %v524_v24  ;;  %2081 = vmatpush.bf16.msra.mxu3 %v2740_v35  ;;  %v2724_v24 = vld [vmem:[%s3963_s1 + $0x158] sm:$0xff]  ;;  %v780_v35 = vrot.slane %v3394_v25, 1 }
  0xca   : > { %v3405_v56 = vadd.f32 %v3325_v21, %v1490_v43  ;;  %v648_v43 = vshll.u32 %v3079_v49, 16  ;;  %1903 = vmatpush.bf16.msra.mxu1 %v2724_v24 }
  0xcb   : > { %4000 = vst [vmem:[#allocation14_spill] sm:$0xff] %v3401_v41  ;;  %v3407_v58 = vpop.f32.mrf.mxu0  ;;  %v3471_v24 = vsel %vm757_vm1, %v779_v26, %v780_v35 }
  0xcc   : > { %4006 = vst [vmem:[#allocation20_spill] sm:$0xff] %v3471_v24 }
  0xcf   : > { %v1510_v6 = vpop.f32.mrf.mxu2 }
  0xd0   : > { %v3413_v55 = vadd.f32 %v3325_v21, %v1510_v6  ;;  %v1530_v7 = vpop.f32.mrf.mxu3  ;;  %v650_v6 = vrot.slane %v648_v43, 1 }
  0xd1   : > { %v3416_v10 = vadd.f32 %v3325_v21, %v1530_v7  ;;  %v1493_v11 = vpop.f32.mrf.mxu1  ;;  %v653_v7 = vshll.u32 %v3440_v39, 16 }
  0xd2   : > { %v3422_v16 = vadd.f32 %v3325_v21, %v1493_v11  ;;  %v325_v11 = vmax.f32 %v271_v51, 0.0 }
  0xd3   : > { %4001 = vst [vmem:[#allocation15_spill] sm:$0xff] %v3416_v10  ;;  %v3424_v20 = vpop.f32.mrf.mxu0  ;;  %v655_v43 = vrot.slane %v653_v7, 1 }
  0xd4   : > { %1581 = vmatmul.bf16.gmra.mxu1 %v3387_v19  ;;  %1670 = vmatmul.bf16.gmra.mxu2 %v3419_v14  ;;  %v1464_v19 = vadd.f32 %v3325_v21, %v3333_v33  ;;  %v2731_v33 = vld [vmem:[%s3963_s1 + $0x190] sm:$0xff] }
  0xd5   : > { %1759 = vmatmul.bf16.gmra.mxu3 %v3231_v28  ;;  %1993 = vmatpush.bf16.msra.mxu2 %v2731_v33 }
  0xd6   : > { %1848 = vmatmul.bf16.gmra.mxu0 %v3427_v42 }
  0xd7   : > { %v1513_v60 = vpop.f32.mrf.mxu2 }
  0xd8   : > { %v3444_v61 = vadd.f32 %v3325_v21, %v1513_v60  ;;  %v1533_v62 = vpop.f32.mrf.mxu3  ;;  %v651_v60 = vor.u32 %v650_v6, %v646_v3  ;;  %v220_v6 = vld [vmem:[%s3052_s9 + $0x80] sm:$0x1] }
  0xd9   : > { %v3447_v1 = vadd.f32 %v3325_v21, %v1533_v62  ;;  %v1495_v2 = vpop.f32.mrf.mxu1  ;;  %v379_v62 = vpack.c.bf16 %v325_v11, %v325_v11  ;;  %v274_v7 = vunpack.c.l.bf16 %v220_v6 }
  0xda   : > { %v3451_v4 = vadd.f32 %v3325_v21, %v1495_v2  ;;  %v3479_v25 = vsel %vm548_vm0, %v651_v60, %v655_v43 }
  0xdb   : > { %4004 = vst [vmem:[#allocation18_spill] sm:$0xff] %v3447_v1  ;;  %v3453_v5 = vpop.f32.mrf.mxu0  ;;  %v525_v3 = vunpack.c.l.b16 %v379_v62  ;;  %v658_v62 = vshrl.u32 %v3149_v47, 16  ;;  %v328_v6 = vmax.f32 %v274_v7, 0.0 }
  0xdc   : > { %4007 = vst [vmem:[#allocation21_spill] sm:$0xff] %v3479_v25 }
  0xdf   : > { %v1515_v2 = vpop.f32.mrf.mxu2 }
  0xe0   : > { %v3465_v51 = vadd.f32 %v3325_v21, %v1515_v2  ;;  %v1535_v1 = vpop.f32.mrf.mxu3 }
  0xe1   : > { %v3468_v10 = vadd.f32 %v3325_v21, %v1535_v1  ;;  %v1498_v41 = vpop.f32.mrf.mxu1  ;;  %v3486_v1 = vpack.c.b16 %v525_v3, %v525_v3 }
  0xe2   : > { %v3474_v53 = vadd.f32 %v3325_v21, %v1498_v41  ;;  %v660_v41 = vshll.u32 %v3149_v47, 16 }
  0xe3   : > { %4005 = vst [vmem:[#allocation19_spill] sm:$0xff] %v3468_v10  ;;  %v3476_v28 = vpop.f32.mrf.mxu0  ;;  %v786_v33 = vrot.slane %v3486_v1, 1 }
  0xe4   : > { %1586 = vmatmul.bf16.gmra.mxu1 %v3427_v42  ;;  %1675 = vmatmul.bf16.gmra.mxu2 %v3471_v24  ;;  %v662_v3 = vrot.slane %v660_v41, 1  ;;  %v665_v24 = vshll.u32 %v3486_v1, 16  ;;  %v782_v42 = vrot.slane %v3079_v49, 1 }
  0xe5   : > { %1764 = vmatmul.bf16.gmra.mxu3 %v3079_v49 }
  0xe6   : > { %1853 = vmatmul.bf16.gmra.mxu0 %v3479_v25  ;;  %v663_v15 = vor.u32 %v662_v3, %v658_v62  ;;  %v223_v3 = vld [vmem:[%s3052_s9 + $0x8c] sm:$0x1] }
  0xe7   : > { %v1518_v11 = vpop.f32.mrf.mxu2 }
  0xe8   : > { %v3490_v26 = vadd.f32 %v3325_v21, %v1518_v11  ;;  %v1538_v35 = vpop.f32.mrf.mxu3  ;;  %v783_v11 = vrot.slane %v3440_v39, 1 }
  0xe9   : > { %v3493_v60 = vadd.f32 %v3325_v21, %v1538_v35  ;;  %v1500_v43 = vpop.f32.mrf.mxu1  ;;  %v667_v35 = vrot.slane %v665_v24, 1 }
  0xea   : > { %v3497_v2 = vadd.f32 %v3325_v21, %v1500_v43  ;;  %v3513_v49 = vsel %vm757_vm1, %v782_v42, %v783_v11 }
  0xeb   : > { %4008 = vst [vmem:[#allocation22_spill] sm:$0xff] %v3493_v60  ;;  %v3499_v10 = vpop.f32.mrf.mxu0  ;;  %v382_v60 = vpack.c.bf16 %v328_v6, %v328_v6  ;;  %v3516_v24 = vsel %vm548_vm0, %v663_v15, %v667_v35  ;;  %v2739_v15 = vld [vmem:[%s3963_s1 + $0x1d0] sm:$0xff] }
  0xec   : > { %4011 = vst [vmem:[#allocation25_spill] sm:$0xff] %v3513_v49  ;;  %2082 = vmatpush.bf16.msra.mxu3 %v2739_v15 }
  0xed   : > { %v526_v62 = vunpack.c.l.b16 %v382_v60  ;;  %v1466_v60 = vadd.f32 %v3325_v21, %v3365_v0  ;;  %v2747_v0 = vld [vmem:[%s3963_s1 + $0x210] sm:$0xff] }
  0xee   : > { %2171 = vmatpush.bf16.msra.mxu0 %v2747_v0 }
  0xef   : > { %v1520_v14 = vpop.f32.mrf.mxu2 }
  0xf0   : > { %v3507_v43 = vadd.f32 %v3325_v21, %v1520_v14  ;;  %v1540_v36 = vpop.f32.mrf.mxu3  ;;  %v277_v14 = vunpack.c.l.bf16 %v223_v3  ;;  %v2723_v3 = vld [vmem:[%s3963_s1 + $0x150] sm:$0xff] }
  0xf1   : > { %v3510_v41 = vadd.f32 %v3325_v21, %v1540_v36  ;;  %v1552_v7 = vpop.f32.mrf.mxu1  ;;  %v672_v36 = vshll.u32 %v3207_v37, 16  ;;  %1904 = vmatpush.bf16.msra.mxu1 %v2723_v3 }
  0xf2   : > { %4009 = vst [vmem:[#allocation23_spill] sm:$0xff] %v3507_v43  ;;  %v1553_v59 = vadd.f32 %v1552_v7, %v1464_v19  ;;  %v3530_v19 = vpack.c.b16 %v526_v62, %v526_v62  ;;  %v670_v7 = vshrl.u32 %v3207_v37, 16  ;;  %v331_v62 = vmax.f32 %v277_v14, 0.0 }
  0xf3   : > { %4010 = vst [vmem:[#allocation24_spill] sm:$0xff] %v3510_v41  ;;  %v1819_v39 = vpop.f32.mrf.mxu0  ;;  %v674_v41 = vrot.slane %v672_v36, 1  ;;  %v785_v36 = vrot.slane %v3149_v47, 1 }
  0xf4   : > { %1591 = vmatmul.bf16.gmra.mxu1 %v3479_v25  ;;  %1680 = vmatmul.bf16.gmra.mxu2 %v3513_v49  ;;  %v677_v17 = vshll.u32 %v3530_v19, 16  ;;  %v385_v14 = vpack.c.bf16 %v331_v62, %v331_v62  ;;  %v1471_v62 = vadd.f32 %v3325_v21, %v3407_v58 }
  0xf5   : > { %1769 = vmatmul.bf16.gmra.mxu3 %v3149_v47  ;;  %v675_v15 = vor.u32 %v674_v41, %v670_v7  ;;  %v3549_v3 = vsel %vm757_vm1, %v785_v36, %v786_v33  ;;  %v226_v41 = vld [vmem:[%s3052_s9 + $0x98] sm:$0x1] }
  0xf6   : > { %1858 = vmatmul.bf16.gmra.mxu0 %v3516_v24  ;;  %v527_v1 = vunpack.c.l.b16 %v385_v14 }
  0xf7   : > { %v1641_v42 = vpop.f32.mrf.mxu2 }
  0xf8   : > { %v1642_v6 = vadd.f32 %v1641_v42, %v1553_v59  ;;  %v1730_v11 = vpop.f32.mrf.mxu3  ;;  %v679_v42 = vrot.slane %v677_v17, 1 }
  0xf9   : > { %v1554_v35 = vpop.f32.mrf.mxu1 }
  0xfa   : > { %v1731_v49 = vadd.f32 %v1730_v11, %v1642_v6  ;;  %v1555_v25 = vadd.f32 %v1554_v35, %v1466_v60  ;;  %v1469_v6 = vadd.f32 %v3325_v21, %v3384_v12  ;;  %v684_v12 = vshll.u32 %v3233_v29, 16 }
  0xfb   : > { %v1821_v43 = vpop.f32.mrf.mxu0 }
  0xfc   : > { %v3542_v59 = vadd.f32 %v1819_v39, %v1731_v49 }
  0xfe   : > { %4012 = vst [vmem:[#allocation26_spill] sm:$0xff] %v3542_v59  ;;  %v3552_v59 = vsel %vm548_vm0, %v675_v15, %v679_v42  ;;  %v682_v42 = vshrl.u32 %v3233_v29, 16 }
  0xff   : > { %v1643_v60 = vpop.f32.mrf.mxu2 }
 0x100   : > { %v1644_v11 = vadd.f32 %v1643_v60, %v1555_v25  ;;  %v1732_v35 = vpop.f32.mrf.mxu3  ;;  %v3562_v25 = vpack.c.b16 %v527_v1, %v527_v1  ;;  %v788_v1 = vrot.slane %v3207_v37, 1 }
 0x101   : > { %v1557_v34 = vpop.f32.mrf.mxu1 }
 0x102   : > { %v1733_v49 = vadd.f32 %v1732_v35, %v1644_v11  ;;  %v1558_v39 = vadd.f32 %v1557_v34, %v1469_v6  ;;  %v280_v34 = vunpack.c.l.bf16 %v226_v41  ;;  %v689_v11 = vshll.u32 %v3562_v25, 16 }
 0x103   : > { %v1824_v0 = vpop.f32.mrf.mxu0  ;;  %v789_v41 = vrot.slane %v3530_v19, 1 }
 0x104   : > { %1596 = vmatmul.bf16.gmra.mxu1 %v3516_v24  ;;  %1685 = vmatmul.bf16.gmra.mxu2 %v3549_v3  ;;  %v3557_v17 = vadd.f32 %v1821_v43, %v1733_v49  ;;  %v686_v43 = vrot.slane %v684_v12, 1  ;;  %v334_v35 = vmax.f32 %v280_v34, 0.0  ;;  %v1474_v12 = vadd.f32 %v3325_v21, %v3424_v20 }
 0x105   : > { %1774 = vmatmul.bf16.gmra.mxu3 %v3207_v37  ;;  %v696_v20 = vshll.u32 %v3087_v54, 16 }
 0x106   : > { %4013 = vst [vmem:[#allocation27_spill] sm:$0xff] %v3557_v17  ;;  %1863 = vmatmul.bf16.gmra.mxu0 %v3552_v59  ;;  %v687_v58 = vor.u32 %v686_v43, %v682_v42  ;;  %v229_v42 = vld [vmem:[%s3052_s9 + $0xa4] sm:$0x1] }
 0x107   : > { %v1646_v7 = vpop.f32.mrf.mxu2 }
 0x108   : > { %v1647_v36 = vadd.f32 %v1646_v7, %v1558_v39  ;;  %v1735_v33 = vpop.f32.mrf.mxu3  ;;  %v691_v39 = vrot.slane %v689_v11, 1  ;;  %v388_v7 = vpack.c.bf16 %v334_v35, %v334_v35  ;;  %v283_v35 = vunpack.c.l.bf16 %v229_v42  ;;  %v2722_v42 = vld [vmem:[%s3963_s1 + $0x148] sm:$0xff] }
 0x109   : > { %v1559_v15 = vpop.f32.mrf.mxu1  ;;  %1905 = vmatpush.bf16.msra.mxu1 %v2722_v42 }
 0x10a   : > { %v1736_v14 = vadd.f32 %v1735_v33, %v1647_v36  ;;  %v1560_v60 = vadd.f32 %v1559_v15, %v1471_v62  ;;  %v3575_v15 = vsel %vm757_vm1, %v788_v1, %v789_v41  ;;  %v528_v19 = vunpack.c.l.b16 %v388_v7 }
 0x10b   : > { %v1826_v6 = vpop.f32.mrf.mxu0  ;;  %v694_v7 = vshrl.u32 %v3087_v54, 16 }
 0x10c   : > { %v3568_v49 = vadd.f32 %v1824_v0, %v1736_v14  ;;  %v3594_v11 = vpack.c.b16 %v528_v19, %v528_v19  ;;  %v337_v19 = vmax.f32 %v283_v35, 0.0 }
 0x10e   : > { %4014 = vst [vmem:[#allocation28_spill] sm:$0xff] %v3568_v49  ;;  %v3578_v49 = vsel %vm548_vm0, %v687_v58, %v691_v39  ;;  %v391_v35 = vpack.c.bf16 %v337_v19, %v337_v19  ;;  %v1481_v19 = vadd.f32 %v3325_v21, %v3499_v10 }
 0x10f   : > { %v1648_v17 = vpop.f32.mrf.mxu2 }
 0x110   : > { %v1649_v36 = vadd.f32 %v1648_v17, %v1560_v60  ;;  %v1737_v62 = vpop.f32.mrf.mxu3  ;;  %v2730_v17 = vld [vmem:[%s3963_s1 + $0x188] sm:$0xff] }
 0x111   : > { %v1562_v33 = vpop.f32.mrf.mxu1  ;;  %v2738_v60 = vld [vmem:[%s3963_s1 + $0x1c8] sm:$0xff]  ;;  %1994 = vmatpush.bf16.msra.mxu2 %v2730_v17  ;;  %v792_v17 = vrot.slane %v3562_v25, 1  ;;  %v529_v25 = vunpack.c.l.b16 %v391_v35 }
 0x112   : > { %v1738_v0 = vadd.f32 %v1737_v62, %v1649_v36  ;;  %v1563_v34 = vadd.f32 %v1562_v33, %v1474_v12  ;;  %2083 = vmatpush.bf16.msra.mxu3 %v2738_v60  ;;  %v698_v12 = vrot.slane %v696_v20, 1  ;;  %v791_v20 = vrot.slane %v3233_v29, 1 }
 0x113   : > { %v1829_v14 = vpop.f32.mrf.mxu0 }
 0x114   : > { %1601 = vmatmul.bf16.gmra.mxu1 %v3552_v59  ;;  %1690 = vmatmul.bf16.gmra.mxu2 %v3575_v15  ;;  %v3583_v43 = vadd.f32 %v1826_v6, %v1738_v0  ;;  %v1476_v6 = vadd.f32 %v3325_v21, %v3453_v5  ;;  %v701_v0 = vshll.u32 %v3594_v11, 16  ;;  %v2746_v5 = vld [vmem:[%s3963_s1 + $0x208] sm:$0xff]  ;;  %v699_v60 = vor.u32 %v698_v12, %v694_v7  ;;  %v232_v7 = vld [vmem:[%s3052_s9 + $0xb0] sm:$0x1] }
 0x115   : > { %1779 = vmatmul.bf16.gmra.mxu3 %v3233_v29  ;;  %2172 = vmatpush.bf16.msra.mxu0 %v2746_v5  ;;  %v3613_v42 = vsel %vm757_vm1, %v791_v20, %v792_v17 }
 0x116   : > { %4015 = vst [vmem:[#allocation29_spill] sm:$0xff] %v3583_v43  ;;  %1868 = vmatmul.bf16.gmra.mxu0 %v3578_v49 }
 0x117   : > { %v1651_v1 = vpop.f32.mrf.mxu2  ;;  %4017 = vst [vmem:[#allocation31_spill] sm:$0xff] %v3613_v42 }
 0x118   : > { %v1652_v41 = vadd.f32 %v1651_v1, %v1563_v34  ;;  %v1740_v58 = vpop.f32.mrf.mxu3  ;;  %v703_v1 = vrot.slane %v701_v0, 1 }
 0x119   : > { %v1564_v39 = vpop.f32.mrf.mxu1 }
 0x11a   : > { %v1741_v36 = vadd.f32 %v1740_v58, %v1652_v41  ;;  %v1565_v62 = vadd.f32 %v1564_v39, %v1476_v6  ;;  %v1479_v41 = vadd.f32 %v3325_v21, %v3476_v28  ;;  %v708_v28 = vshll.u32 %v3151_v52, 16 }
 0x11b   : > { %v1831_v33 = vpop.f32.mrf.mxu0 }
 0x11c   : > { %v3606_v34 = vadd.f32 %v1829_v14, %v1741_v36 }
 0x11e   : > { %4016 = vst [vmem:[#allocation30_spill] sm:$0xff] %v3606_v34  ;;  %v3616_v34 = vsel %vm548_vm0, %v699_v60, %v703_v1  ;;  %v706_v1 = vshrl.u32 %v3151_v52, 16 }
 0x11f   : > { %v1653_v6 = vpop.f32.mrf.mxu2 }
 0x120   : > { %v1654_v58 = vadd.f32 %v1653_v6, %v1565_v62  ;;  %v1742_v39 = vpop.f32.mrf.mxu3  ;;  %v3626_v62 = vpack.c.b16 %v529_v25, %v529_v25  ;;  %v794_v25 = vrot.slane %v3087_v54, 1 }
 0x121   : > { %v1567_v43 = vpop.f32.mrf.mxu1 }
 0x122   : > { %v1743_v14 = vadd.f32 %v1742_v39, %v1654_v58  ;;  %v1568_v36 = vadd.f32 %v1567_v43, %v1479_v41  ;;  %v286_v43 = vunpack.c.l.bf16 %v232_v7  ;;  %v713_v58 = vshll.u32 %v3626_v62, 16 }
 0x123   : > { %v1834_v5 = vpop.f32.mrf.mxu0  ;;  %v795_v7 = vrot.slane %v3594_v11, 1 }
 0x124   : > { %1606 = vmatmul.bf16.gmra.mxu1 %v3578_v49  ;;  %1695 = vmatmul.bf16.gmra.mxu2 %v3613_v42  ;;  %v3621_v12 = vadd.f32 %v1831_v33, %v1743_v14  ;;  %v710_v33 = vrot.slane %v708_v28, 1  ;;  %v340_v39 = vmax.f32 %v286_v43, 0.0  ;;  %v715_v10 = vrot.slane %v713_v58, 1 }
 0x125   : > { %1784 = vmatmul.bf16.gmra.mxu3 %v3087_v54 }
 0x126   : > { %4018 = vst [vmem:[#allocation32_spill] sm:$0xff] %v3621_v12  ;;  %1873 = vmatmul.bf16.gmra.mxu0 %v3616_v34  ;;  %v711_v21 = vor.u32 %v710_v33, %v706_v1  ;;  %v720_v33 = vshll.u32 %v3209_v40, 16 }
 0x127   : > { %v1656_v0 = vpop.f32.mrf.mxu2 }
 0x128   : > { %v1657_v20 = vadd.f32 %v1656_v0, %v1568_v36  ;;  %v1745_v17 = vpop.f32.mrf.mxu3  ;;  %v394_v36 = vpack.c.bf16 %v340_v39, %v340_v39 }
 0x129   : > { %v1569_v60 = vpop.f32.mrf.mxu1 }
 0x12a   : > { %v1746_v35 = vadd.f32 %v1745_v17, %v1657_v20  ;;  %v1570_v6 = vadd.f32 %v1569_v60, %v1481_v19  ;;  %v3637_v19 = vsel %vm757_vm1, %v794_v25, %v795_v7  ;;  %v3641_v17 = vsel %vm548_vm0, %v711_v21, %v715_v10 }
 0x12b   : > { %v1836_v41 = vpop.f32.mrf.mxu0  ;;  %4020 = vst [vmem:[#allocation34_spill] sm:$0xff] %v3637_v19  ;;  %v530_v60 = vunpack.c.l.b16 %v394_v36  ;;  %v718_v25 = vshrl.u32 %v3209_v40, 16 }
 0x12c   : > { %v3632_v14 = vadd.f32 %v1834_v5, %v1746_v35  ;;  %4021 = vst [vmem:[#allocation35_spill] sm:$0xff] %v3641_v17  ;;  %v235_v35 = vld [vmem:[%s3052_s9 + $0xbc] sm:$0x1] }
 0x12d   : > { %v3656_v1 = vpack.c.b16 %v530_v60, %v530_v60 }
 0x12e   : > { %4019 = vst [vmem:[#allocation33_spill] sm:$0xff] %v3632_v14 }
 0x12f   : > { %v1658_v0 = vpop.f32.mrf.mxu2 }
 0x130   : > { %v1659_v12 = vadd.f32 %v1658_v0, %v1570_v6  ;;  %v1747_v42 = vpop.f32.mrf.mxu3  ;;  %v722_v0 = vrot.slane %v720_v33, 1  ;;  %v2797_v33 = vld [vmem:[%s3052_s9 + $0xc0] sm:$0xff]  }
 0x131   : > { %v1572_v28 = vpop.f32.mrf.mxu1 }
 0x132   : > { %v1748_v20 = vadd.f32 %v1747_v42, %v1659_v12  ;;  %v1573_v43 = vadd.f32 %v1572_v28, %v3331_v32  ;;  %v2729_v32 = vld [vmem:[%s3963_s1 + $0x180] sm:$0xff]  ;;  %v289_v42 = vunpack.c.l.bf16 %v235_v35  ;;  %v725_v28 = vshll.u32 %v3656_v1, 16 }
 0x133   : > { %v1839_v5 = vpop.f32.mrf.mxu0  ;;  %v2737_v12 = vld [vmem:[%s3963_s1 + $0x1c0] sm:$0xff]  ;;  %1995 = vmatpush.bf16.msra.mxu2 %v2729_v32  ;;  %v797_v35 = vrot.slane %v3151_v52, 1 }
 0x134   : > { %1611 = vmatmul.bf16.gmra.mxu1 %v3616_v34  ;;  %1700 = vmatmul.bf16.gmra.mxu2 %v3637_v19  ;;  %v3646_v11 = vadd.f32 %v1836_v41, %v1748_v20  ;;  %v343_v7 = vmax.f32 %v289_v42, 0.0  ;;  %v2721_v20 = vld [vmem:[%s3963_s1 + $0x140] sm:$0xff]  ;;  %v723_v42 = vor.u32 %v722_v0, %v718_v25  ;;  %v238_v25 = vld [vmem:[%s3052_s9 + $0xc8] sm:$0x1] }
 0x135   : > { %1789 = vmatmul.bf16.gmra.mxu3 %v3151_v52  ;;  %1906 = vmatpush.bf16.msra.mxu1 %v2721_v20 }
 0x136   : > { %4022 = vst [vmem:[#allocation36_spill] sm:$0xff] %v3646_v11  ;;  %1878 = vmatmul.bf16.gmra.mxu0 %v3641_v17  ;;  %2084 = vmatpush.bf16.msra.mxu3 %v2737_v12  ;;  %v397_v32 = vpack.c.bf16 %v343_v7, %v343_v7  ;;  %v727_v12 = vrot.slane %v725_v28, 1  ;;  %v2789_v7 = vunpack.c.h.bf16 %v2797_v33 }
 0x137   : > { %v1661_v6 = vpop.f32.mrf.mxu2 }
 0x138   : > { %v1662_v41 = vadd.f32 %v1661_v6, %v1573_v43  ;;  %v1750_v58 = vpop.f32.mrf.mxu3  ;;  %v2745_v43 = vld [vmem:[%s3963_s1 + $0x200] sm:$0xff]  ;;  %v531_v20 = vunpack.c.l.b16 %v397_v32 }
 0x139   : > { %v1574_v39 = vpop.f32.mrf.mxu1  ;;  %2173 = vmatpush.bf16.msra.mxu0 %v2745_v43  ;;  %v2788_v43 = vunpack.c.l.bf16 %v2797_v33 }
 0x13a   : > { %v1751_v21 = vadd.f32 %v1750_v58, %v1662_v41  ;;  %v1575_v10 = vadd.f32 %v1574_v39, %v3363_v63  ;;  %v798_v63 = vrot.slane %v3626_v62, 1  ;;  %v3678_v62 = vsel %vm548_vm0, %v723_v42, %v727_v12 }
 0x13b   : > { %v1841_v36 = vpop.f32.mrf.mxu0  ;;  %v3687_v0 = vpack.c.b16 %v531_v20, %v531_v20  ;;  %v344_v28 = vmax.f32 %v2788_v43, 0.0  ;;  %v800_v43 = vrot.slane %v3209_v40, 1 }
 0x13c   : > { %v3668_v60 = vadd.f32 %v1839_v5, %v1751_v21  ;;  %v3674_v11 = vsel %vm757_vm1, %v797_v35, %v798_v63  ;;  %v345_v35 = vmax.f32 %v2789_v7, 0.0  ;;  %v292_v63 = vunpack.c.l.bf16 %v238_v25 }
 0x13d   : > { %4024 = vst [vmem:[#allocation38_spill] sm:$0xff] %v3674_v11 }
 0x13e   : > { %4023 = vst [vmem:[#allocation37_spill] sm:$0xff] %v3668_v60  ;;  %v346_v14 = vmax.f32 %v292_v63, 0.0 }
 0x13f   : > { %v1663_v6 = vpop.f32.mrf.mxu2 }
 0x140   : > { %v1664_v41 = vadd.f32 %v1663_v6, %v1575_v10  ;;  %v1752_v58 = vpop.f32.mrf.mxu3  ;;  %v730_v6 = vshrl.u32 %v3235_v30, 16 }
 0x141   : > { %v1577_v39 = vpop.f32.mrf.mxu1 }
 0x142   : > { %v1753_v5 = vadd.f32 %v1752_v58, %v1664_v41  ;;  %v1578_v21 = vadd.f32 %v1577_v39, %v3382_v18  ;;  %v732_v18 = vshll.u32 %v3235_v30, 16  ;;  %v398_v58 = vpack.c.bf16 %v344_v28, %v344_v28 }
 0x143   : > { %v1844_v60 = vpop.f32.mrf.mxu0 }
 0x144   : > { %1616 = vmatmul.bf16.gmra.mxu1 %v3641_v17  ;;  %1705 = vmatmul.bf16.gmra.mxu2 %v3674_v11  ;;  %v3683_v10 = vadd.f32 %v1841_v36, %v1753_v5  ;;  %v734_v41 = vrot.slane %v732_v18, 1  ;;  %v737_v36 = vshll.u32 %v3687_v0, 16  ;;  %v400_v18 = vpack.c.bf16 %v346_v14, %v346_v14 }
 0x145   : > { %1794 = vmatmul.bf16.gmra.mxu3 %v3209_v40 }
 0x146   : > { %4025 = vst [vmem:[#allocation39_spill] sm:$0xff] %v3683_v10  ;;  %1883 = vmatmul.bf16.gmra.mxu0 %v3678_v62  ;;  %v399_v10 = vpack.c.bf16 %v345_v35, %v345_v35  ;;  %v735_v7 = vor.u32 %v734_v41, %v730_v6  ;;  %v739_v25 = vrot.slane %v737_v36, 1 }
 0x147   : > { %v1666_v32 = vpop.f32.mrf.mxu2 }
 0x148   : > { %v1667_v42 = vadd.f32 %v1666_v32, %v1578_v21  ;;  %v1755_v12 = vpop.f32.mrf.mxu3  ;;  %v801_v21 = vrot.slane %v3656_v1, 1  ;;  %v824_v32 = vunpack.c.l.b16 %v398_v58  ;;  %v825_v17 = vunpack.c.l.b16 %v399_v10 }
 0x149   : > { %v1579_v33 = vpop.f32.mrf.mxu1  ;;  %v3701_v35 = vsel %vm548_vm0, %v735_v7, %v739_v25  ;;  %v804_v7 = vrot.slane %v3687_v0, 1 }
 0x14a   : > { %v1756_v39 = vadd.f32 %v1755_v12, %v1667_v42  ;;  %v1580_v5 = vadd.f32 %v1579_v33, %v3405_v56  ;;  %v3698_v56 = vsel %vm757_vm1, %v800_v43, %v801_v21  ;;  %v3704_v1 = vpack.c.b16 %v825_v17, %v824_v32 }
 0x14b   : > { %v1846_v20 = vpop.f32.mrf.mxu0  ;;  %v829_v33 = vunpack.c.l.b16 %v400_v18  ;;  %v803_v21 = vrot.slane %v3235_v30, 1 }
 0x14c   : > { %v3693_v11 = vadd.f32 %v1844_v60, %v1756_v39  ;;  %v832_v41 = vshrl.u32 %v3704_v1, 16 }
 0x14d   : > { %v3712_v14 = vpack.c.b16 %v829_v33, %v829_v33 }
 0x14f   : > { %v1668_v52 = vpop.f32.mrf.mxu2 }
 0x150   : > { %v1669_v19 = vadd.f32 %v1668_v52, %v1580_v5  ;;  %v1757_v28 = vpop.f32.mrf.mxu3 }
 0x151   : > { %v1582_v42 = vpop.f32.mrf.mxu1 }
 0x152   : > { %v1758_v60 = vadd.f32 %v1757_v28, %v1669_v19  ;;  %v1583_v63 = vadd.f32 %v1582_v42, %v3422_v16  ;;  %v834_v19 = vshll.u32 %v3704_v1, 16 }
 0x153   : > { %v1849_v12 = vpop.f32.mrf.mxu0 }
 0x154   : > { %1621 = vmatmul.bf16.gmra.mxu1 %v3678_v62  ;;  %1710 = vmatmul.bf16.gmra.mxu2 %v3698_v56  ;;  %v3708_v52 = vadd.f32 %v1846_v20, %v1758_v60  ;;  %v836_v5 = vrot.slane %v834_v19, 1  ;;  %v839_v20 = vshll.u32 %v3712_v14, 16 }
 0x155   : > { %1799 = vmatmul.bf16.gmra.mxu3 %v3235_v30 }
 0x156   : > { %1888 = vmatmul.bf16.gmra.mxu0 %v3701_v35  ;;  %v837_v25 = vor.u32 %v836_v5, %v832_v41  ;;  %v841_v32 = vrot.slane %v839_v20, 1 }
 0x157   : > { %v1671_v10 = vpop.f32.mrf.mxu2 }
 0x158   : > { %v1672_v16 = vadd.f32 %v1671_v10, %v1583_v63  ;;  %v1760_v6 = vpop.f32.mrf.mxu3  ;;  %v3723_v63 = vsel %vm757_vm1, %v803_v21, %v804_v7 }
 0x159   : > { %v1584_v17 = vpop.f32.mrf.mxu1 }
 0x15a   : > { %v1761_v36 = vadd.f32 %v1760_v6, %v1672_v16  ;;  %v1585_v58 = vadd.f32 %v1584_v17, %v3451_v4 }
 0x15b   : > { %v1851_v39 = vpop.f32.mrf.mxu0 }
 0x15c   : > { %v3718_v43 = vadd.f32 %v1849_v12, %v1761_v36  ;;  %v3727_v12 = vsel %vm548_vm0, %v837_v25, %v841_v32 }
 0x15f   : > { %v1673_v18 = vpop.f32.mrf.mxu2 }
 0x160   : > { %v1674_v28 = vadd.f32 %v1673_v18, %v1585_v58  ;;  %v1762_v42 = vpop.f32.mrf.mxu3 }
 0x161   : > { %v1587_v60 = vpop.f32.mrf.mxu1 }
 0x162   : > { %v1763_v4 = vadd.f32 %v1762_v42, %v1674_v28  ;;  %v1588_v33 = vadd.f32 %v1587_v60, %v3474_v53 }
 0x163   : > { %v1854_v19 = vpop.f32.mrf.mxu0 }
 0x164   : > { %1626 = vmatmul.bf16.gmra.mxu1 %v3701_v35  ;;  %1715 = vmatmul.bf16.gmra.mxu2 %v3723_v63  ;;  %v3731_v0 = vadd.f32 %v1851_v39, %v1763_v4 }
 0x165   : > { %1804 = vmatmul.bf16.gmra.mxu3 %v3704_v1 }
 0x166   : > { %1893 = vmatmul.bf16.gmra.mxu0 %v3727_v12 }
 0x167   : > { %v1676_v10 = vpop.f32.mrf.mxu2 }
 0x168   : > { %v1677_v16 = vadd.f32 %v1676_v10, %v1588_v33  ;;  %v1765_v6 = vpop.f32.mrf.mxu3 }
 0x169   : > { %v1589_v17 = vpop.f32.mrf.mxu1 }
 0x16a   : > { %v1766_v41 = vadd.f32 %v1765_v6, %v1677_v16  ;;  %v1590_v53 = vadd.f32 %v1589_v17, %v3497_v2 }
 0x16b   : > { %v1856_v36 = vpop.f32.mrf.mxu0 }
 0x16c   : > { %v3736_v58 = vadd.f32 %v1854_v19, %v1766_v41 }
 0x16f   : > { %v1678_v5 = vpop.f32.mrf.mxu2 }
 0x170   : > { %v1679_v20 = vadd.f32 %v1678_v5, %v1590_v53  ;;  %v1767_v21 = vpop.f32.mrf.mxu3 }
 0x171   : > { %v1592_v7 = vpop.f32.mrf.mxu1 }
 0x172   : > { %v1768_v39 = vadd.f32 %v1767_v21, %v1679_v20  ;;  %v1593_v25 = vadd.f32 %v1592_v7, %v3353_v57 }
 0x173   : > { %v1859_v32 = vpop.f32.mrf.mxu0 }
 0x174   : > { %1907 = vmatmul.bf16.vlgmr.msra.gmra.mxu1 %v3270_v22  ;;  %1996 = vmatmul.bf16.vlgmr.msra.gmra.mxu2 %v3211_v44  ;;  %v3741_v18 = vadd.f32 %v1856_v36, %v1768_v39 }
 0x175   : > { %2085 = vmatmul.bf16.vlgmr.msra.gmra.mxu3 %v3273_v23 }
 0x176   : > { %2174 = vmatmul.bf16.vlgmr.msra.gmra.mxu0 %v3283_v45 }
 0x177   : > { %v1681_v2 = vpop.f32.mrf.mxu2 }
 0x178   : > { %v1682_v28 = vadd.f32 %v1681_v2, %v1593_v25  ;;  %v1770_v42 = vpop.f32.mrf.mxu3 }
 0x179   : > { %v1594_v60 = vpop.f32.mrf.mxu1 }
 0x17a   : > { %v1771_v4 = vadd.f32 %v1770_v42, %v1682_v28  ;;  %v1595_v33 = vadd.f32 %v1594_v60, %v3373_v13 }
 0x17b   : > { %v1861_v19 = vpop.f32.mrf.mxu0 }
 0x17c   : > { %v3746_v57 = vadd.f32 %v1859_v32, %v1771_v4 }
 0x17f   : > { %v1683_v10 = vpop.f32.mrf.mxu2 }
 0x180   : > { %v1684_v22 = vadd.f32 %v1683_v10, %v1595_v33  ;;  %v1772_v16 = vpop.f32.mrf.mxu3 }
 0x181   : > { %v1597_v44 = vpop.f32.mrf.mxu1 }
 0x182   : > { %v1773_v6 = vadd.f32 %v1772_v16, %v1684_v22  ;;  %v1598_v17 = vadd.f32 %v1597_v44, %v3398_v38 }
 0x183   : > { %v1864_v23 = vpop.f32.mrf.mxu0 }
 0x184   : > { %1912 = vmatmul.bf16.gmra.mxu1 %v3283_v45  ;;  %2001 = vmatmul.bf16.gmra.mxu2 %v3237_v31  ;;  %v3751_v41 = vadd.f32 %v1861_v19, %v1773_v6 }
 0x185   : > { %2090 = vmatmul.bf16.gmra.mxu3 %v3286_v50 }
 0x186   : > { %2179 = vmatmul.bf16.gmra.mxu0 %v3309_v8 }
 0x187   : > { %v1686_v13 = vpop.f32.mrf.mxu2 }
 0x188   : > { %v1687_v53 = vadd.f32 %v1686_v13, %v1598_v17  ;;  %v1775_v36 = vpop.f32.mrf.mxu3 }
 0x189   : > { %v1599_v5 = vpop.f32.mrf.mxu1 }
 0x18a   : > { %v1776_v20 = vadd.f32 %v1775_v36, %v1687_v53  ;;  %v1600_v21 = vadd.f32 %v1599_v5, %v3413_v55 }
 0x18b   : > { %v1866_v7 = vpop.f32.mrf.mxu0 }
 0x18c   : > { %v3756_v38 = vadd.f32 %v1864_v23, %v1776_v20  ;;  %v4026_v23 = vld [vmem:[#allocation9_spill] sm:$0xff] }
 0x18f   : > { %v1688_v39 = vpop.f32.mrf.mxu2 }
 0x190   : > { %v1689_v45 = vadd.f32 %v1688_v39, %v1600_v21  ;;  %v1777_v25 = vpop.f32.mrf.mxu3  ;;  %v4028_v21 = vld [vmem:[#allocation23_spill] sm:$0xff] }
 0x191   : > { %v1602_v31 = vpop.f32.mrf.mxu1 }
 0x192   : > { %v1778_v32 = vadd.f32 %v1777_v25, %v1689_v45  ;;  %v1603_v2 = vadd.f32 %v1602_v31, %v3444_v61 }
 0x193   : > { %v1869_v50 = vpop.f32.mrf.mxu0 }
 0x194   : > { %1917 = vmatmul.bf16.gmra.mxu1 %v3309_v8  ;;  %2006 = vmatmul.bf16.gmra.mxu2 %v3077_v48  ;;  %v3761_v28 = vadd.f32 %v1866_v7, %v1778_v32  ;;  %v4029_v32 = vld [vmem:[#allocation10_spill] sm:$0xff] }
 0x195   : > { %2095 = vmatmul.bf16.gmra.mxu3 %v3312_v9 }
 0x196   : > { %2184 = vmatmul.bf16.gmra.mxu0 %v3328_v27 }
 0x197   : > { %v1691_v55 = vpop.f32.mrf.mxu2 }
 0x198   : > { %v1692_v42 = vadd.f32 %v1691_v55, %v1603_v2  ;;  %v1780_v60 = vpop.f32.mrf.mxu3  ;;  %v4030_v55 = vld [vmem:[#allocation7_spill] sm:$0xff] }
 0x199   : > { %v1604_v4 = vpop.f32.mrf.mxu1 }
 0x19a   : > { %v1781_v33 = vadd.f32 %v1780_v60, %v1692_v42  ;;  %v1605_v19 = vadd.f32 %v1604_v4, %v3465_v51  ;;  %v4027_v51 = vld [vmem:[#allocation12_spill] sm:$0xff]  ;;  %v4031_v60 = vld [vmem:[#allocation13_spill] sm:$0xff] }
 0x19b   : > { %v1871_v10 = vpop.f32.mrf.mxu0  ;;  %v4032_v4 = vld [vmem:[#allocation16_spill] sm:$0xff] }
 0x19c   : > { %v3766_v61 = vadd.f32 %v1869_v50, %v1781_v33 }
 0x19f   : > { %v1693_v22 = vpop.f32.mrf.mxu2 }
 0x1a0   : > { %v1694_v8 = vadd.f32 %v1693_v22, %v1605_v19  ;;  %v1782_v16 = vpop.f32.mrf.mxu3 }
 0x1a1   : > { %v1607_v48 = vpop.f32.mrf.mxu1 }
 0x1a2   : > { %v1783_v44 = vadd.f32 %v1782_v16, %v1694_v8  ;;  %v1608_v6 = vadd.f32 %v1607_v48, %v3490_v26  ;;  %v4033_v16 = vld [vmem:[#allocation11_spill] sm:$0xff] }
 0x1a3   : > { %v1874_v9 = vpop.f32.mrf.mxu0 }
 0x1a4   : > { %1922 = vmatmul.bf16.gmra.mxu1 %v3328_v27  ;;  %2011 = vmatmul.bf16.gmra.mxu2 %v3147_v46  ;;  %v3771_v17 = vadd.f32 %v1871_v10, %v1783_v44 }
 0x1a5   : > { %2100 = vmatmul.bf16.gmra.mxu3 %v4026_v23 }
 0x1a6   : > { %2189 = vmatmul.bf16.gmra.mxu0 %v4027_v51 }
 0x1a7   : > { %v1696_v13 = vpop.f32.mrf.mxu2 }
 0x1a8   : > { %v1697_v53 = vadd.f32 %v1696_v13, %v1608_v6  ;;  %v1785_v36 = vpop.f32.mrf.mxu3 }
 0x1a9   : > { %v1609_v5 = vpop.f32.mrf.mxu1 }
 0x1aa   : > { %v1786_v20 = vadd.f32 %v1785_v36, %v1697_v53  ;;  %v1610_v7 = vadd.f32 %v1609_v5, %v4028_v21  ;;  %v4034_v36 = vld [vmem:[#allocation14_spill] sm:$0xff]  ;;  %v4035_v21 = vld [vmem:[#allocation8_spill] sm:$0xff] }
 0x1ab   : > { %v1876_v39 = vpop.f32.mrf.mxu0 }
 0x1ac   : > { %v3776_v26 = vadd.f32 %v1874_v9, %v1786_v20 }
 0x1af   : > { %v1698_v45 = vpop.f32.mrf.mxu2 }
 0x1b0   : > { %v1699_v27 = vadd.f32 %v1698_v45, %v1610_v7  ;;  %v1787_v25 = vpop.f32.mrf.mxu3  ;;  %v4037_v45 = vld [vmem:[#allocation20_spill] sm:$0xff] }
 0x1b1   : > { %v1612_v46 = vpop.f32.mrf.mxu1 }
 0x1b2   : > { %v1788_v31 = vadd.f32 %v1787_v25, %v1699_v27  ;;  %v1613_v2 = vadd.f32 %v1612_v46, %v4029_v32 }
 0x1b3   : > { %v1879_v50 = vpop.f32.mrf.mxu0 }
 0x1b4   : > { %1927 = vmatmul.bf16.gmra.mxu1 %v4027_v51  ;;  %2016 = vmatmul.bf16.gmra.mxu2 %v4030_v55  ;;  %v3781_v42 = vadd.f32 %v1876_v39, %v1788_v31  ;;  %v4036_v39 = vld [vmem:[#allocation17_spill] sm:$0xff] }
 0x1b5   : > { %2105 = vmatmul.bf16.gmra.mxu3 %v4031_v60 }
 0x1b6   : > { %2194 = vmatmul.bf16.gmra.mxu0 %v4032_v4 }
 0x1b7   : > { %v1701_v33 = vpop.f32.mrf.mxu2 }
 0x1b8   : > { %v1702_v19 = vadd.f32 %v1701_v33, %v1613_v2  ;;  %v1790_v10 = vpop.f32.mrf.mxu3  ;;  %v4038_v2 = vld [vmem:[#allocation15_spill] sm:$0xff] }
 0x1b9   : > { %v1614_v22 = vpop.f32.mrf.mxu1 }
 0x1ba   : > { %v1791_v8 = vadd.f32 %v1790_v10, %v1702_v19  ;;  %v1615_v48 = vadd.f32 %v1614_v22, %v4033_v16 }
 0x1bb   : > { %v1881_v44 = vpop.f32.mrf.mxu0 }
 0x1bc   : > { %v3786_v6 = vadd.f32 %v1879_v50, %v1791_v8  ;;  %v4039_v8 = vld [vmem:[#allocation18_spill] sm:$0xff] }
 0x1bf   : > { %v1703_v9 = vpop.f32.mrf.mxu2 }
 0x1c0   : > { %v1704_v23 = vadd.f32 %v1703_v9, %v1615_v48  ;;  %v1792_v51 = vpop.f32.mrf.mxu3 }
 0x1c1   : > { %v1617_v13 = vpop.f32.mrf.mxu1 }
 0x1c2   : > { %v1793_v53 = vadd.f32 %v1792_v51, %v1704_v23  ;;  %v1618_v5 = vadd.f32 %v1617_v13, %v4034_v36  ;;  %v4041_v23 = vld [vmem:[#allocation21_spill] sm:$0xff] }
 0x1c3   : > { %v1884_v20 = vpop.f32.mrf.mxu0  ;;  %v4042_v51 = vld [vmem:[#allocation25_spill] sm:$0xff] }
 0x1c4   : > { %1932 = vmatmul.bf16.gmra.mxu1 %v4032_v4  ;;  %2021 = vmatmul.bf16.gmra.mxu2 %v4035_v21  ;;  %v3791_v7 = vadd.f32 %v1881_v44, %v1793_v53  ;;  %v4040_v44 = vld [vmem:[#allocation5_spill] sm:$0xff]  ;;  %v4043_v21 = vld [vmem:[#allocation19_spill] sm:$0xff] }
 0x1c5   : > { %2110 = vmatmul.bf16.gmra.mxu3 %v4036_v39 }
 0x1c6   : > { %2199 = vmatmul.bf16.gmra.mxu0 %v4037_v45 }
 0x1c7   : > { %v1706_v27 = vpop.f32.mrf.mxu2 }
 0x1c8   : > { %v1707_v25 = vadd.f32 %v1706_v27, %v1618_v5  ;;  %v1795_v46 = vpop.f32.mrf.mxu3 }
 0x1c9   : > { %v1619_v31 = vpop.f32.mrf.mxu1 }
 0x1ca   : > { %v1796_v32 = vadd.f32 %v1795_v46, %v1707_v25  ;;  %v1620_v50 = vadd.f32 %v1619_v31, %v4038_v2 }
 0x1cb   : > { %v1886_v55 = vpop.f32.mrf.mxu0 }
 0x1cc   : > { %v3796_v60 = vadd.f32 %v1884_v20, %v1796_v32 }
 0x1cf   : > { %v1708_v33 = vpop.f32.mrf.mxu2 }
 0x1d0   : > { %v1709_v4 = vadd.f32 %v1708_v33, %v1620_v50  ;;  %v1797_v19 = vpop.f32.mrf.mxu3  ;;  %v4044_v50 = vld [vmem:[#allocation22_spill] sm:$0xff] }
 0x1d1   : > { %v1622_v10 = vpop.f32.mrf.mxu1 }
 0x1d2   : > { %v1798_v22 = vadd.f32 %v1797_v19, %v1709_v4  ;;  %v1623_v16 = vadd.f32 %v1622_v10, %v4039_v8 }
 0x1d3   : > { %v1889_v48 = vpop.f32.mrf.mxu0 }
 0x1d4   : > { %1937 = vmatmul.bf16.gmra.mxu1 %v4037_v45  ;;  %2026 = vmatmul.bf16.gmra.mxu2 %v4040_v44  ;;  %v3801_v9 = vadd.f32 %v1886_v55, %v1798_v22 }
 0x1d5   : > { %2115 = vmatmul.bf16.gmra.mxu3 %v4041_v23 }
 0x1d6   : > { %2204 = vmatmul.bf16.gmra.mxu0 %v4042_v51 }
 0x1d7   : > { %v1711_v13 = vpop.f32.mrf.mxu2 }
 0x1d8   : > { %v1712_v53 = vadd.f32 %v1711_v13, %v1623_v16  ;;  %v1800_v36 = vpop.f32.mrf.mxu3 }
 0x1d9   : > { %v1624_v5 = vpop.f32.mrf.mxu1 }
 0x1da   : > { %v1801_v20 = vadd.f32 %v1800_v36, %v1712_v53  ;;  %v1625_v39 = vadd.f32 %v1624_v5, %v4043_v21  ;;  %v4046_v21 = vld [vmem:[#allocation26_spill] sm:$0xff] }
 0x1db   : > { %v1891_v27 = vpop.f32.mrf.mxu0 }
 0x1dc   : > { %v3806_v25 = vadd.f32 %v1889_v48, %v1801_v20  ;;  %v4045_v48 = vld [vmem:[#allocation24_spill] sm:$0xff] }
 0x1df   : > { %v1713_v46 = vpop.f32.mrf.mxu2 }
 0x1e0   : > { %v1714_v45 = vadd.f32 %v1713_v46, %v1625_v39  ;;  %v1802_v31 = vpop.f32.mrf.mxu3 }
 0x1e1   : > { %v1627_v32 = vpop.f32.mrf.mxu1 }
 0x1e2   : > { %v1803_v2 = vadd.f32 %v1802_v31, %v1714_v45  ;;  %v1628_v55 = vadd.f32 %v1627_v32, %v4044_v50 }
 0x1e3   : > { %v1894_v33 = vpop.f32.mrf.mxu0 }
 0x1e4   : > { %1942 = vmatmul.bf16.gmra.mxu1 %v4042_v51  ;;  %2031 = vmatmul.bf16.gmra.mxu2 %v3149_v47  ;;  %v3811_v4 = vadd.f32 %v1891_v27, %v1803_v2 }
 0x1e5   : > { %2120 = vmatmul.bf16.gmra.mxu3 %v3516_v24 }
 0x1e6   : > { %2209 = vmatmul.bf16.gmra.mxu0 %v3549_v3 }
 0x1e7   : > { %v1716_v19 = vpop.f32.mrf.mxu2 }
 0x1e8   : > { %v1717_v10 = vadd.f32 %v1716_v19, %v1628_v55  ;;  %v1805_v22 = vpop.f32.mrf.mxu3 }
 0x1e9   : > { %v1629_v8 = vpop.f32.mrf.mxu1 }
 0x1ea   : > { %v1806_v16 = vadd.f32 %v1805_v22, %v1717_v10  ;;  %v1630_v44 = vadd.f32 %v1629_v8, %v4045_v48  ;;  %v4049_v48 = vld [vmem:[#allocation28_spill] sm:$0xff] }
 0x1eb   : > { %v1896_v23 = vpop.f32.mrf.mxu0 }
 0x1ec   : > { %v3816_v13 = vadd.f32 %v1894_v33, %v1806_v16  ;;  %v4048_v16 = vld [vmem:[#allocation31_spill] sm:$0xff] }
 0x1ef   : > { %v1718_v51 = vpop.f32.mrf.mxu2 }
 0x1f0   : > { %v1719_v47 = vadd.f32 %v1718_v51, %v1630_v44  ;;  %v1807_v53 = vpop.f32.mrf.mxu3 }
 0x1f1   : > { %v1908_v36 = vpop.f32.mrf.mxu1 }
 0x1f2   : > { %v1808_v5 = vadd.f32 %v1807_v53, %v1719_v47  ;;  %v1909_v39 = vadd.f32 %v1908_v36, %v4046_v21  ;;  %v4050_v21 = vld [vmem:[#allocation29_spill] sm:$0xff] }
 0x1f3   : > { %v2175_v24 = vpop.f32.mrf.mxu0 }
 0x1f4   : > { %1947 = vmatmul.bf16.gmra.mxu1 %v3549_v3  ;;  %2036 = vmatmul.bf16.gmra.mxu2 %v3207_v37  ;;  %v3820_v20 = vadd.f32 %v1896_v23, %v1808_v5  ;;  %v4047_v37 = vld [vmem:[#allocation27_spill] sm:$0xff] }
 0x1f5   : > { %2125 = vmatmul.bf16.gmra.mxu3 %v3552_v59 }
 0x1f6   : > { %2214 = vmatmul.bf16.gmra.mxu0 %v3575_v15 }
 0x1f7   : > { %v1997_v27 = vpop.f32.mrf.mxu2 }
 0x1f8   : > { %v1998_v46 = vadd.f32 %v1997_v27, %v1909_v39  ;;  %v2086_v45 = vpop.f32.mrf.mxu3 }
 0x1f9   : > { %v1910_v31 = vpop.f32.mrf.mxu1 }
 0x1fa   : > { %v2087_v32 = vadd.f32 %v2086_v45, %v1998_v46  ;;  %v1911_v59 = vadd.f32 %v1910_v31, %v4047_v37 }
 0x1fb   : > { %v2177_v2 = vpop.f32.mrf.mxu0 }
 0x1fc   : > { %v2176_v3 = vadd.f32 %v2175_v24, %v2087_v32  ;;  %v4051_v32 = vld [vmem:[#allocation34_spill] sm:$0xff] }
 0x1fe   : > { %2255 = vst [vmem:[%s3828_s7] sm:$0xff] %v2176_v3 }
 0x1ff   : > { %v1999_v50 = vpop.f32.mrf.mxu2 }
 0x200   : > { %v2000_v55 = vadd.f32 %v1999_v50, %v1911_v59  ;;  %v2088_v33 = vpop.f32.mrf.mxu3 }
 0x201   : > { %v1913_v19 = vpop.f32.mrf.mxu1 }
 0x202   : > { %v2089_v10 = vadd.f32 %v2088_v33, %v2000_v55  ;;  %v1914_v44 = vadd.f32 %v1913_v19, %v4049_v48 }
 0x203   : > { %v2180_v22 = vpop.f32.mrf.mxu0 }
 0x204   : > { %v2178_v8 = vadd.f32 %v2177_v2, %v2089_v10  ;;  %1952 = vmatmul.bf16.gmra.mxu1 %v3575_v15  ;;  %2041 = vmatmul.bf16.gmra.mxu2 %v3233_v29  ;;  %v4052_v2 = vld [vmem:[#allocation30_spill] sm:$0xff] }
 0x205   : > { %2130 = vmatmul.bf16.gmra.mxu3 %v3578_v49 }
 0x206   : > { %2219 = vmatmul.bf16.gmra.mxu0 %v4048_v16  ;;  %2256 = vst [vmem:[%s3828_s7 + $0x8] sm:$0xff] %v2178_v8 }
 0x207   : > { %v2002_v23 = vpop.f32.mrf.mxu2 }
 0x208   : > { %v2003_v51 = vadd.f32 %v2002_v23, %v1914_v44  ;;  %v2091_v47 = vpop.f32.mrf.mxu3 }
 0x209   : > { %v1915_v53 = vpop.f32.mrf.mxu1 }
 0x20a   : > { %v2092_v36 = vadd.f32 %v2091_v47, %v2003_v51  ;;  %v1916_v15 = vadd.f32 %v1915_v53, %v4050_v21  ;;  %v4054_v47 = vld [vmem:[#allocation6_spill] sm:$0xff]  ;;  %v4055_v53 = vld [vmem:[#allocation35_spill] sm:$0xff] }
 0x20b   : > { %v2182_v5 = vpop.f32.mrf.mxu0 }
 0x20c   : > { %v2181_v24 = vadd.f32 %v2180_v22, %v2092_v36  ;;  %v4053_v22 = vld [vmem:[#allocation32_spill] sm:$0xff]  ;;  %v4056_v36 = vld [vmem:[#allocation38_spill] sm:$0xff] }
 0x20e   : > { %2257 = vst [vmem:[%s3828_s7 + $0x10] sm:$0xff] %v2181_v24 }
 0x20f   : > { %v2004_v39 = vpop.f32.mrf.mxu2 }
 0x210   : > { %v2005_v29 = vadd.f32 %v2004_v39, %v1916_v15  ;;  %v2093_v27 = vpop.f32.mrf.mxu3 }
 0x211   : > { %v1918_v49 = vpop.f32.mrf.mxu1 }
 0x212   : > { %v2094_v46 = vadd.f32 %v2093_v27, %v2005_v29  ;;  %v1919_v3 = vadd.f32 %v1918_v49, %v4052_v2 }
 0x213   : > { %v2185_v45 = vpop.f32.mrf.mxu0 }
 0x214   : > { %v2183_v31 = vadd.f32 %v2182_v5, %v2094_v46  ;;  %1957 = vmatmul.bf16.gmra.mxu1 %v4048_v16  ;;  %2046 = vmatmul.bf16.gmra.mxu2 %v3087_v54  ;;  %v4057_v5 = vld [vmem:[#allocation33_spill] sm:$0xff] }
 0x215   : > { %2135 = vmatmul.bf16.gmra.mxu3 %v3616_v34 }
 0x216   : > { %2224 = vmatmul.bf16.gmra.mxu0 %v4051_v32  ;;  %2258 = vst [vmem:[%s3828_s7 + $0x18] sm:$0xff] %v2183_v31 }
 0x217   : > { %v2007_v37 = vpop.f32.mrf.mxu2 }
 0x218   : > { %v2008_v59 = vadd.f32 %v2007_v37, %v1919_v3  ;;  %v2096_v50 = vpop.f32.mrf.mxu3 }
 0x219   : > { %v1920_v55 = vpop.f32.mrf.mxu1 }
 0x21a   : > { %v2097_v33 = vadd.f32 %v2096_v50, %v2008_v59  ;;  %v1921_v8 = vadd.f32 %v1920_v55, %v4053_v22 }
 0x21b   : > { %v2187_v19 = vpop.f32.mrf.mxu0 }
 0x21c   : > { %v2186_v10 = vadd.f32 %v2185_v45, %v2097_v33  ;;  %v4058_v45 = vld [vmem:[#allocation36_spill] sm:$0xff]  ;;  %v4059_v33 = vld [vmem:[#allocation37_spill] sm:$0xff] }
 0x21e   : > { %2259 = vst [vmem:[%s3828_s7 + $0x20] sm:$0xff] %v2186_v10 }
 0x21f   : > { %v2009_v16 = vpop.f32.mrf.mxu2 }
 0x220   : > { %v2010_v54 = vadd.f32 %v2009_v16, %v1921_v8  ;;  %v2098_v48 = vpop.f32.mrf.mxu3 }
 0x221   : > { %v1923_v34 = vpop.f32.mrf.mxu1 }
 0x222   : > { %v2099_v44 = vadd.f32 %v2098_v48, %v2010_v54  ;;  %v1924_v24 = vadd.f32 %v1923_v34, %v4057_v5 }
 0x223   : > { %v2190_v23 = vpop.f32.mrf.mxu0 }
 0x224   : > { %v2188_v51 = vadd.f32 %v2187_v19, %v2099_v44  ;;  %1962 = vmatmul.bf16.gmra.mxu1 %v4051_v32  ;;  %2051 = vmatmul.bf16.gmra.mxu2 %v4054_v47  ;;  %v4060_v44 = vld [vmem:[#allocation39_spill] sm:$0xff] }
 0x225   : > { %2140 = vmatmul.bf16.gmra.mxu3 %v4055_v53 }
 0x226   : > { %2229 = vmatmul.bf16.gmra.mxu0 %v4056_v36  ;;  %2260 = vst [vmem:[%s3828_s7 + $0x28] sm:$0xff] %v2188_v51 }
 0x227   : > { %v2012_v21 = vpop.f32.mrf.mxu2 }
 0x228   : > { %v2013_v15 = vadd.f32 %v2012_v21, %v1924_v24  ;;  %v2101_v39 = vpop.f32.mrf.mxu3 }
 0x229   : > { %v1925_v29 = vpop.f32.mrf.mxu1 }
 0x22a   : > { %v2102_v27 = vadd.f32 %v2101_v39, %v2013_v15  ;;  %v1926_v31 = vadd.f32 %v1925_v29, %v4058_v45  ;;  %v241_v15 = vld [vmem:[%s3052_s9 + $0xd4] sm:$0x1] }
 0x22b   : > { %v2192_v49 = vpop.f32.mrf.mxu0  ;;  %v295_v29 = vunpack.c.l.bf16 %v241_v15 }
 0x22c   : > { %v2191_v46 = vadd.f32 %v2190_v23, %v2102_v27 }
 0x22e   : > { %2261 = vst [vmem:[%s3828_s7 + $0x30] sm:$0xff] %v2191_v46 }
 0x22f   : > { %v2014_v32 = vpop.f32.mrf.mxu2 }
 0x230   : > { %v2015_v2 = vadd.f32 %v2014_v32, %v1926_v31  ;;  %v2103_v3 = vpop.f32.mrf.mxu3 }
 0x231   : > { %v1928_v37 = vpop.f32.mrf.mxu1 }
 0x232   : > { %v2104_v59 = vadd.f32 %v2103_v3, %v2015_v2  ;;  %v1929_v19 = vadd.f32 %v1928_v37, %v4059_v33  ;;  %v349_v3 = vmax.f32 %v295_v29, 0.0 }
 0x233   : > { %v2195_v50 = vpop.f32.mrf.mxu0 }
 0x234   : > { %v2193_v55 = vadd.f32 %v2192_v49, %v2104_v59  ;;  %1967 = vmatmul.bf16.gmra.mxu1 %v4056_v36  ;;  %2056 = vmatmul.bf16.gmra.mxu2 %v3209_v40  ;;  %v239_v40 = vld [vmem:[%s3052_s9 + $0xcc] sm:$0xff]   ;;  %s2753_s9 = sshll.u32 %s2951_s15, 8  ;;  %s2288_s15 = scalar_lea.sflag [#allocation3], %s175_s5 }
 0x235   : > { %2145 = vmatmul.bf16.gmra.mxu3 %v3678_v62  ;;  %v293_v24 = vunpack.c.l.bf16 %v239_v40  ;;  %v294_v21 = vunpack.c.h.bf16 %v239_v40  ;;  %s2302_s11 = scalar_lea.hbm %s3965_s3, %s2753_s9 }
 0x236   : > { %2234 = vmatmul.bf16.gmra.mxu0 %v3698_v56  ;;  %2262 = vst [vmem:[%s3828_s7 + $0x38] sm:$0xff] %v2193_v55  ;;  %v403_v55 = vpack.c.bf16 %v349_v3, %v349_v3  ;;  %s2305_s19 = sshll.u32 %s2302_s11, 4  ;;  %s2306_s19 = int_to_ptr.hbm [resolvable:$true] %s2305_s19 }
 0x237   : > { %v2017_v10 = vpop.f32.mrf.mxu2  ;;  %v347_v49 = vmax.f32 %v293_v24, 0.0  ;;  %v348_v46 = vmax.f32 %v294_v21, 0.0  ;;  %s2895_s21 = sshra.s32 %s2306_s19, 4  ;;  %s2896_s21 = int_to_ptr.hbm [resolvable:$true] %s2895_s21 }
 0x238   : > { %v2018_v22 = vadd.f32 %v2017_v10, %v1929_v19  ;;  %v2106_v8 = vpop.f32.mrf.mxu3  ;;  %s2897_s23 = scalar_lea.hbm %s2896_s21, 256  ;;  %p2902_p1 = scmp.lt.s32.totalorder %s2896_s21, %s3965_s3 }
 0x239   : > { %v1930_v16 = vpop.f32.mrf.mxu1  ;;  %v401_v59 = vpack.c.bf16 %v347_v49, %v347_v49  ;;  %p2898_p12 = scmp.ne.s32.totalorder %s2896_s21, %s2897_s23  ;;  %p2903_p2 = scmp.lt.s32.totalorder %s2901_s28, %s2897_s23 }
 0x23a   : > { %v2107_v54 = vadd.f32 %v2106_v8, %v2018_v22  ;;  %v1931_v23 = vadd.f32 %v1930_v16, %v4060_v44 }
 0x23b   : > { %v2197_v48 = vpop.f32.mrf.mxu0  ;;  %v850_v19 = vunpack.c.l.b16 %v401_v59  ;;  %p2899_p13 = pnand %p2898_p12, %p3023_p4  ;;  %p2904_p3 = por %p2903_p2, %p2902_p1 }
 0x23c   : > { %v2196_v34 = vadd.f32 %v2195_v50, %v2107_v54 }
 0x23d   : > { %p2900_p0 = pneg %p2899_p13 }
 0x23e   : > { %2263 = vst [vmem:[%s3828_s7 + $0x40] sm:$0xff] %v2196_v34 }
 0x23f   : > { %v2019_v51 = vpop.f32.mrf.mxu2  ;;  %p2905_p5 = pnand %p2904_p3, %p2900_p0 }
 0x240   : > { %v2020_v62 = vadd.f32 %v2019_v51, %v1931_v23  ;;  %v2108_v47 = vpop.f32.mrf.mxu3 }
 0x241   : > { %v1933_v53 = vpop.f32.mrf.mxu1 }
 0x242   : > { %v2109_v36 = vadd.f32 %v2108_v47, %v2020_v62  ;;  %v1934_v27 = vadd.f32 %v1933_v53, %v3693_v11  ;;  %v845_v11 = vrot.slane %v3712_v14, 1 }
 0x243   : > { %v2200_v5 = vpop.f32.mrf.mxu0 }
 0x244   : > { %v2198_v39 = vadd.f32 %v2197_v48, %v2109_v36  ;;  %1972 = vmatmul.bf16.gmra.mxu1 %v3698_v56  ;;  %2061 = vmatmul.bf16.gmra.mxu2 %v3235_v30  ;;  %v402_v30 = vpack.c.bf16 %v348_v46, %v348_v46  ;;  %v855_v48 = vunpack.c.l.b16 %v403_v55 }
 0x245   : > { %2150 = vmatmul.bf16.gmra.mxu3 %v3701_v35  ;;  %v844_v35 = vrot.slane %v3704_v1, 1 }
 0x246   : > { %2239 = vmatmul.bf16.gmra.mxu0 %v3723_v63  ;;  %2264 = vst [vmem:[%s3828_s7 + $0x48] sm:$0xff] %v2198_v39  ;;  %v851_v10 = vunpack.c.l.b16 %v402_v30 }
 0x247   : > { %v2022_v45 = vpop.f32.mrf.mxu2  ;;  %v846_v23 = vsel %vm757_vm1, %v844_v35, %v845_v11 }
 0x248   : > { %v2023_v31 = vadd.f32 %v2022_v45, %v1934_v27  ;;  %v2111_v32 = vpop.f32.mrf.mxu3  ;;  %v852_v51 = vpack.c.b16 %v851_v10, %v850_v19 }
 0x249   : > { %v1935_v2 = vpop.f32.mrf.mxu1 }
 0x24a   : > { %v2112_v37 = vadd.f32 %v2111_v32, %v2023_v31  ;;  %v1936_v33 = vadd.f32 %v1935_v2, %v3708_v52  ;;  %v856_v52 = vpack.c.b16 %v855_v48, %v855_v48  ;;  %v860_v62 = vshll.u32 %v852_v51, 16 }
 0x24b   : > { %v2202_v56 = vpop.f32.mrf.mxu0  ;;  %v858_v39 = vshrl.u32 %v852_v51, 16  ;;  %v870_v49 = vrot.slane %v852_v51, 1 }
 0x24c   : > { %v2201_v50 = vadd.f32 %v2200_v5, %v2112_v37  ;;  %v865_v24 = vshll.u32 %v856_v52, 16  ;;  %v871_v46 = vrot.slane %v856_v52, 1 }
 0x24e   : > { %2265 = vst [vmem:[%s3828_s7 + $0x50] sm:$0xff] %v2201_v50 }
 0x24f   : > { %v2024_v22 = vpop.f32.mrf.mxu2 }
 0x250   : > { %v2025_v8 = vadd.f32 %v2024_v22, %v1936_v33  ;;  %v2113_v16 = vpop.f32.mrf.mxu3 }
 0x251   : > { %v1938_v54 = vpop.f32.mrf.mxu1 }
 0x252   : > { %v2114_v34 = vadd.f32 %v2113_v16, %v2025_v8  ;;  %v1939_v14 = vadd.f32 %v1938_v54, %v3718_v43 }
 0x253   : > { %v2205_v44 = vpop.f32.mrf.mxu0 }
 0x254   : > { %v2203_v40 = vadd.f32 %v2202_v56, %v2114_v34  ;;  %1977 = vmatmul.bf16.gmra.mxu1 %v3723_v63  ;;  %2066 = vmatmul.bf16.gmra.mxu2 %v3704_v1  ;;  %v862_v63 = vrot.slane %v860_v62, 1  ;;  %v867_v1 = vrot.slane %v865_v24, 1  ;;  %v872_v56 = vsel %vm757_vm1, %v870_v49, %v871_v46 }
 0x255   : > { %2155 = vmatmul.bf16.gmra.mxu3 %v3727_v12 }
 0x256   : > { %2244 = vmatmul.bf16.gmra.mxu0 %v846_v23  ;;  %2266 = vst [vmem:[%s3828_s7 + $0x58] sm:$0xff] %v2203_v40  ;;  %v863_v27 = vor.u32 %v862_v63, %v858_v39 }
 0x257   : > { %v2027_v47 = vpop.f32.mrf.mxu2 }
 0x258   : > { %v2028_v53 = vadd.f32 %v2027_v47, %v1939_v14  ;;  %v2116_v36 = vpop.f32.mrf.mxu3  ;;  %v868_v37 = vsel %vm548_vm0, %v863_v27, %v867_v1 }
 0x259   : > { %v1940_v5 = vpop.f32.mrf.mxu1 }
 0x25a   : > { %v2117_v21 = vadd.f32 %v2116_v36, %v2028_v53  ;;  %v1941_v12 = vadd.f32 %v1940_v5, %v3731_v0 }
 0x25b   : > { %v2207_v15 = vpop.f32.mrf.mxu0 }
 0x25c   : > { %v2206_v29 = vadd.f32 %v2205_v44, %v2117_v21 }
 0x25e   : > { %2267 = vst [vmem:[%s3828_s7 + $0x60] sm:$0xff] %v2206_v29 }
 0x25f   : > { %v2029_v43 = vpop.f32.mrf.mxu2 }
 0x260   : > { %v2030_v45 = vadd.f32 %v2029_v43, %v1941_v12  ;;  %v2118_v31 = vpop.f32.mrf.mxu3 }
 0x261   : > { %v1943_v32 = vpop.f32.mrf.mxu1 }
 0x262   : > { %v2119_v2 = vadd.f32 %v2118_v31, %v2030_v45  ;;  %v1944_v0 = vadd.f32 %v1943_v32, %v3736_v58 }
 0x263   : > { %v2210_v3 = vpop.f32.mrf.mxu0 }
 0x264   : > { %v2208_v59 = vadd.f32 %v2207_v15, %v2119_v2  ;;  %1982 = vmatmul.bf16.gmra.mxu1 %v846_v23  ;;  %2071 = vmatmul.bf16.gmra.mxu2 %v852_v51 }
 0x265   : > { %2160 = vmatmul.bf16.gmra.mxu3 %v868_v37 }
 0x266   : > { %2249 = vmatmul.bf16.gmra.mxu0 %v872_v56  ;;  %2268 = vst [vmem:[%s3828_s7 + $0x68] sm:$0xff] %v2208_v59 }
 0x267   : > { %v2032_v30 = vpop.f32.mrf.mxu2 }
 0x268   : > { %v2033_v50 = vadd.f32 %v2032_v30, %v1944_v0  ;;  %v2121_v35 = vpop.f32.mrf.mxu3 }
 0x269   : > { %v1945_v55 = vpop.f32.mrf.mxu1 }
 0x26a   : > { %v2122_v33 = vadd.f32 %v2121_v35, %v2033_v50  ;;  %v1946_v10 = vadd.f32 %v1945_v55, %v3741_v18 }
 0x26b   : > { %v2212_v11 = vpop.f32.mrf.mxu0 }
 0x26c   : > { %v2211_v19 = vadd.f32 %v2210_v3, %v2122_v33 }
 0x26e   : > { %2269 = vst [vmem:[%s3828_s7 + $0x70] sm:$0xff] %v2211_v19 }
 0x26f   : > { %v2034_v22 = vpop.f32.mrf.mxu2 }
 0x270   : > { %v2035_v8 = vadd.f32 %v2034_v22, %v1946_v10  ;;  %v2123_v16 = vpop.f32.mrf.mxu3 }
 0x271   : > { %v1948_v54 = vpop.f32.mrf.mxu1 }
 0x272   : > { %v2124_v48 = vadd.f32 %v2123_v16, %v2035_v8  ;;  %v1949_v58 = vadd.f32 %v1948_v54, %v3746_v57 }
 0x273   : > { %v2215_v34 = vpop.f32.mrf.mxu0 }
 0x274   : > { %v2213_v44 = vadd.f32 %v2212_v11, %v2124_v48 }
 0x276   : > { %2270 = vst [vmem:[%s3828_s7 + $0x78] sm:$0xff] %v2213_v44 }
 0x277   : > { %v2037_v23 = vpop.f32.mrf.mxu2 }
 0x278   : > { %v2038_v51 = vadd.f32 %v2037_v23, %v1949_v58  ;;  %v2126_v40 = vpop.f32.mrf.mxu3 }
 0x279   : > { %v1950_v52 = vpop.f32.mrf.mxu1 }
 0x27a   : > { %v2127_v14 = vadd.f32 %v2126_v40, %v2038_v51  ;;  %v1951_v18 = vadd.f32 %v1950_v52, %v3751_v41 }
 0x27b   : > { %v2217_v62 = vpop.f32.mrf.mxu0 }
 0x27c   : > { %v2216_v47 = vadd.f32 %v2215_v34, %v2127_v14 }
 0x27e   : > { %2271 = vst [vmem:[%s3828_s7 + $0x80] sm:$0xff] %v2216_v47 }
 0x27f   : > { %v2039_v53 = vpop.f32.mrf.mxu2 }
 0x280   : > { %v2040_v36 = vadd.f32 %v2039_v53, %v1951_v18  ;;  %v2128_v5 = vpop.f32.mrf.mxu3 }
 0x281   : > { %v1953_v24 = vpop.f32.mrf.mxu1 }
 0x282   : > { %v2129_v21 = vadd.f32 %v2128_v5, %v2040_v36  ;;  %v1954_v57 = vadd.f32 %v1953_v24, %v3756_v38 }
 0x283   : > { %v2220_v15 = vpop.f32.mrf.mxu0 }
 0x284   : > { %v2218_v39 = vadd.f32 %v2217_v62, %v2129_v21 }
 0x286   : > { %2272 = vst [vmem:[%s3828_s7 + $0x88] sm:$0xff] %v2218_v39 }
 0x287   : > { %v2042_v63 = vpop.f32.mrf.mxu2 }
 0x288   : > { %v2043_v29 = vadd.f32 %v2042_v63, %v1954_v57  ;;  %v2131_v1 = vpop.f32.mrf.mxu3 }
 0x289   : > { %v1955_v12 = vpop.f32.mrf.mxu1 }
 0x28a   : > { %v2132_v27 = vadd.f32 %v2131_v1, %v2043_v29  ;;  %v1956_v41 = vadd.f32 %v1955_v12, %v3761_v28 }
 0x28b   : > { %v2222_v49 = vpop.f32.mrf.mxu0 }
 0x28c   : > { %v2221_v46 = vadd.f32 %v2220_v15, %v2132_v27 }
 0x28e   : > { %2273 = vst [vmem:[%s3828_s7 + $0x90] sm:$0xff] %v2221_v46 }
 0x28f   : > { %v2044_v43 = vpop.f32.mrf.mxu2 }
 0x290   : > { %v2045_v45 = vadd.f32 %v2044_v43, %v1956_v41  ;;  %v2133_v31 = vpop.f32.mrf.mxu3 }
 0x291   : > { %v1958_v32 = vpop.f32.mrf.mxu1 }
 0x292   : > { %v2134_v2 = vadd.f32 %v2133_v31, %v2045_v45  ;;  %v1959_v38 = vadd.f32 %v1958_v32, %v3766_v61 }
 0x293   : > { %v2225_v3 = vpop.f32.mrf.mxu0 }
 0x294   : > { %v2223_v37 = vadd.f32 %v2222_v49, %v2134_v2 }
 0x296   : > { %2274 = vst [vmem:[%s3828_s7 + $0x98] sm:$0xff] %v2223_v37 }
 0x297   : > { %v2047_v56 = vpop.f32.mrf.mxu2 }
 0x298   : > { %v2048_v59 = vadd.f32 %v2047_v56, %v1959_v38  ;;  %v2136_v0 = vpop.f32.mrf.mxu3 }
 0x299   : > { %v1960_v30 = vpop.f32.mrf.mxu1 }
 0x29a   : > { %v2137_v50 = vadd.f32 %v2136_v0, %v2048_v59  ;;  %v1961_v28 = vadd.f32 %v1960_v30, %v3771_v17 }
 0x29b   : > { %v2227_v35 = vpop.f32.mrf.mxu0 }
 0x29c   : > { %v2226_v55 = vadd.f32 %v2225_v3, %v2137_v50 }
 0x29e   : > { %2275 = vst [vmem:[%s3828_s7 + $0xa0] sm:$0xff] %v2226_v55 }
 0x29f   : > { %v2049_v33 = vpop.f32.mrf.mxu2 }
 0x2a0   : > { %v2050_v11 = vadd.f32 %v2049_v33, %v1961_v28  ;;  %v2138_v19 = vpop.f32.mrf.mxu3 }
 0x2a1   : > { %v1963_v10 = vpop.f32.mrf.mxu1 }
 0x2a2   : > { %v2139_v22 = vadd.f32 %v2138_v19, %v2050_v11  ;;  %v1964_v61 = vadd.f32 %v1963_v10, %v3776_v26 }
 0x2a3   : > { %v2230_v8 = vpop.f32.mrf.mxu0 }
 0x2a4   : > { %v2228_v16 = vadd.f32 %v2227_v35, %v2139_v22 }
 0x2a6   : > { %2276 = vst [vmem:[%s3828_s7 + $0xa8] sm:$0xff] %v2228_v16 }
 0x2a7   : > { %v2052_v54 = vpop.f32.mrf.mxu2 }
 0x2a8   : > { %v2053_v48 = vadd.f32 %v2052_v54, %v1964_v61  ;;  %v2141_v34 = vpop.f32.mrf.mxu3 }
 0x2a9   : > { %v1965_v44 = vpop.f32.mrf.mxu1 }
 0x2aa   : > { %v2142_v58 = vadd.f32 %v2141_v34, %v2053_v48  ;;  %v1966_v17 = vadd.f32 %v1965_v44, %v3781_v42 }
 0x2ab   : > { %v2232_v23 = vpop.f32.mrf.mxu0 }
 0x2ac   : > { %v2231_v51 = vadd.f32 %v2230_v8, %v2142_v58 }
 0x2ae   : > { %2277 = vst [vmem:[%s3828_s7 + $0xb0] sm:$0xff] %v2231_v51 }
 0x2af   : > { %v2054_v40 = vpop.f32.mrf.mxu2 }
 0x2b0   : > { %v2055_v52 = vadd.f32 %v2054_v40, %v1966_v17  ;;  %v2143_v14 = vpop.f32.mrf.mxu3 }
 0x2b1   : > { %v1968_v62 = vpop.f32.mrf.mxu1 }
 0x2b2   : > { %v2144_v47 = vadd.f32 %v2143_v14, %v2055_v52  ;;  %v1969_v26 = vadd.f32 %v1968_v62, %v3786_v6 }
 0x2b3   : > { %v2235_v18 = vpop.f32.mrf.mxu0 }
 0x2b4   : > { %v2233_v53 = vadd.f32 %v2232_v23, %v2144_v47 }
 0x2b6   : > { %2278 = vst [vmem:[%s3828_s7 + $0xb8] sm:$0xff] %v2233_v53 }
 0x2b7   : > { %v2057_v36 = vpop.f32.mrf.mxu2 }
 0x2b8   : > { %v2058_v5 = vadd.f32 %v2057_v36, %v1969_v26  ;;  %v2146_v24 = vpop.f32.mrf.mxu3 }
 0x2b9   : > { %v1970_v21 = vpop.f32.mrf.mxu1 }
 0x2ba   : > { %v2147_v15 = vadd.f32 %v2146_v24, %v2058_v5  ;;  %v1971_v42 = vadd.f32 %v1970_v21, %v3791_v7 }
 0x2bb   : > { %v2237_v39 = vpop.f32.mrf.mxu0 }
 0x2bc   : > { %v2236_v57 = vadd.f32 %v2235_v18, %v2147_v15 }
 0x2be   : > { %2279 = vst [vmem:[%s3828_s7 + $0xc0] sm:$0xff] %v2236_v57 }
 0x2bf   : > { %v2059_v63 = vpop.f32.mrf.mxu2 }
 0x2c0   : > { %v2060_v29 = vadd.f32 %v2059_v63, %v1971_v42  ;;  %v2148_v1 = vpop.f32.mrf.mxu3 }
 0x2c1   : > { %v1973_v12 = vpop.f32.mrf.mxu1 }
 0x2c2   : > { %v2149_v27 = vadd.f32 %v2148_v1, %v2060_v29  ;;  %v1974_v6 = vadd.f32 %v1973_v12, %v3796_v60 }
 0x2c3   : > { %v2240_v49 = vpop.f32.mrf.mxu0 }
 0x2c4   : > { %v2238_v46 = vadd.f32 %v2237_v39, %v2149_v27 }
 0x2c6   : > { %2280 = vst [vmem:[%s3828_s7 + $0xc8] sm:$0xff] %v2238_v46 }
 0x2c7   : > { %v2062_v41 = vpop.f32.mrf.mxu2 }
 0x2c8   : > { %v2063_v43 = vadd.f32 %v2062_v41, %v1974_v6  ;;  %v2151_v45 = vpop.f32.mrf.mxu3 }
 0x2c9   : > { %v1975_v31 = vpop.f32.mrf.mxu1 }
 0x2ca   : > { %v2152_v32 = vadd.f32 %v2151_v45, %v2063_v43  ;;  %v1976_v7 = vadd.f32 %v1975_v31, %v3801_v9 }
 0x2cb   : > { %v2242_v2 = vpop.f32.mrf.mxu0 }
 0x2cc   : > { %v2241_v3 = vadd.f32 %v2240_v49, %v2152_v32 }
 0x2ce   : > { %2281 = vst [vmem:[%s3828_s7 + $0xd0] sm:$0xff] %v2241_v3 }
 0x2cf   : > { %v2064_v37 = vpop.f32.mrf.mxu2 }
 0x2d0   : > { %v2065_v38 = vadd.f32 %v2064_v37, %v1976_v7  ;;  %v2153_v56 = vpop.f32.mrf.mxu3 }
 0x2d1   : > { %v1978_v59 = vpop.f32.mrf.mxu1 }
 0x2d2   : > { %v2154_v0 = vadd.f32 %v2153_v56, %v2065_v38  ;;  %v1979_v60 = vadd.f32 %v1978_v59, %v3806_v25 }
 0x2d3   : > { %v2245_v50 = vpop.f32.mrf.mxu0 }
 0x2d4   : > { %v2243_v30 = vadd.f32 %v2242_v2, %v2154_v0 }
 0x2d6   : > { %2282 = vst [vmem:[%s3828_s7 + $0xd8] sm:$0xff] %v2243_v30 }
 0x2d7   : > { %v2067_v35 = vpop.f32.mrf.mxu2 }
 0x2d8   : > { %v2068_v55 = vadd.f32 %v2067_v35, %v1979_v60  ;;  %v2156_v28 = vpop.f32.mrf.mxu3 }
 0x2d9   : > { %v1980_v33 = vpop.f32.mrf.mxu1 }
 0x2da   : > { %v2157_v11 = vadd.f32 %v2156_v28, %v2068_v55  ;;  %v1981_v9 = vadd.f32 %v1980_v33, %v3811_v4 }
 0x2db   : > { %v2247_v10 = vpop.f32.mrf.mxu0 }
 0x2dc   : > { %v2246_v19 = vadd.f32 %v2245_v50, %v2157_v11 }
 0x2de   : > { %2283 = vst [vmem:[%s3828_s7 + $0xe0] sm:$0xff] %v2246_v19 }
 0x2df   : > { %v2069_v22 = vpop.f32.mrf.mxu2 }
 0x2e0   : > { %v2070_v8 = vadd.f32 %v2069_v22, %v1981_v9  ;;  %v2158_v16 = vpop.f32.mrf.mxu3 }
 0x2e1   : > { %v1983_v61 = vpop.f32.mrf.mxu1 }
 0x2e2   : > { %v2159_v54 = vadd.f32 %v2158_v16, %v2070_v8  ;;  %v1984_v25 = vadd.f32 %v1983_v61, %v3816_v13 }
 0x2e3   : > { %v2250_v23 = vpop.f32.mrf.mxu0 }
 0x2e4   : > { %v2248_v48 = vadd.f32 %v2247_v10, %v2159_v54 }
 0x2e6   : > { %2284 = vst [vmem:[%s3828_s7 + $0xe8] sm:$0xff] %v2248_v48 }
 0x2e7   : > { %v2072_v34 = vpop.f32.mrf.mxu2 }
 0x2e8   : > { %v2073_v44 = vadd.f32 %v2072_v34, %v1984_v25  ;;  %v2161_v58 = vpop.f32.mrf.mxu3 }
 0x2e9   : > { %v1985_v4 = vpop.f32.mrf.mxu1 }
 0x2ea   : > { %v2162_v51 = vadd.f32 %v2161_v58, %v2073_v44  ;;  %v1986_v40 = vadd.f32 %v1985_v4, %v3820_v20 }
 0x2eb   : > { %v2252_v47 = vpop.f32.mrf.mxu0 }
 0x2ec   : > { %v2251_v17 = vadd.f32 %v2250_v23, %v2162_v51 }
 0x2ee   : > { %2285 = vst [vmem:[%s3828_s7 + $0xf0] sm:$0xff] %v2251_v17 }
 0x2ef   : > { %v2074_v52 = vpop.f32.mrf.mxu2 }
 0x2f0   : > { %v2075_v13 = vadd.f32 %v2074_v52, %v1986_v40  ;;  %v2163_v14 = vpop.f32.mrf.mxu3 }
 0x2f2   : > { %v2164_v62 = vadd.f32 %v2163_v14, %v2075_v13 }
 0x2f4   : > { %v2253_v18 = vadd.f32 %v2252_v47, %v2164_v62 }
 0x2f6   : > { %2286 = vst [vmem:[%s3828_s7 + $0xf8] sm:$0xff] %v2253_v18 }
 0x2f7   : > { %2908 = shalt.err (!%p2905_p5)
}
 0x2f8   : > { %s2961_s4 = smov 128   ;;  %s2962_s5 = smov 8  }
 0x2f9   : > { %2823 = dma.vmem_to_hbm [thread:$0]  (%p3023_p4), %s2304_s18, 4096, %s2306_s19, %s2288_s15, %s2961_s4, %s2961_s4, %s2962_s5  }
 0x2fa PF: > { %p2829_p6 = scmp.ge.s32.totalorder %s2959_s17, 2  ;;  %s2320_s6 = sand.u32 1, %s2939_s12  }
 0x2fb   : > { %s2321_s7 = scalar_lea.sflag [#allocation3], %s2320_s6 }
 0x2fc   : > { %p2826_p7 = pnand %p2829_p6, %p3030_p8 }
 0x2fe   : > { %p2827_p9 = pneg %p2826_p7 }
 0x300   : > { %2934 = dma.done.wait (%p2827_p9), %s2321_s7, 4096  }
 0x301   : > { %2936 = vsyncadd (%p2827_p9), %s2321_s7, 4294963200  ;;  %s16_s17 = sadd.s32 1, %s2959_s17   ;;  %s4061_s12 = smov %s2943_s13 }
 0x302   : > { %p13_p10 = scmp.ge.s32.totalorder %s16_s17, 4   ;;  %s4062_s13 = smov %s2947_s14 }
 0x303   : > { %s4063_s14 = smov %s3036_s25  ;;  %s4064_s15 = smov %s2955_s16 }
 0x304   : > { %s4065_s16 = smov %s4067_s20  ;;  %15 = sbr.rel (!%p13_p10) target bundleno = 4 (0x4), region = 68 }
 0x309   :  { %2327 = vsyncpa [#allocation3], 1 }
 0x30a   :  { %2329 = vsyncpa [#allocation3 + $0x1], 1 }

</bundles_post_ra>
